<compile_context>
chip_gen: v7x
topology: tpu7x:2x2x1
jax: 0.10.0
libtpu: 0.0.40
codegen_flags: <defaults>
</compile_context>

<pallas_src>
import functools
import math

import jax
import jax.numpy as jnp
import numpy as np
from jax import lax
from jax.experimental import pallas as pl
from jax.experimental.pallas import tpu as pltpu


def _lstm_autoencoder_kernel(
    x_ref,      # (T*B, I)   time-major rows: row = t*B + b
    wa_ref,     # (I+H+1, 4H) slab A: enc_wih^T | enc_whh^T | enc_b
    wb_ref,     # (I+H+1, 4I) slab B: dec_whh^T | folded enc->dec W | bias
    out_ref,    # (B, T*I)   lane-dense output slab
    *, T, B, I, H,
):
    f32 = jnp.float32
    sig = jax.nn.sigmoid

    # ---- static views into the packed weight slabs (aligned, one-time) ----
    enc_wih = wa_ref[0:I, :]                   # (I, 4H)
    enc_whh = wa_ref[I:I + H, :]               # (H, 4H) fused i|f|g|o
    enc_b   = wa_ref[I + H:I + H + 1, :]       # (1, 4H)
    dec_whh = wb_ref[0:I, :]                   # (I, 4I) fused i|f|g|o
    e2d_w   = wb_ref[I:I + H, :]               # (H, 4I) lat∘din∘dec_wih fold
    e2d_b   = wb_ref[I + H:I + H + 1, :]       # (1, 4I)

    # ---------------- encoder LSTM (input=I, hidden=H) ---------------------
    # Hoisted input projection: one (T*B,I)x(I,4H) MXU matmul off the
    # serial chain; kept dense, sliced per step as an aligned row block.
    xg = jnp.dot(x_ref[...], enc_wih, preferred_element_type=f32) + enc_b  # (T*B,4H)

    h = jnp.zeros((B, H), f32)
    c = jnp.zeros((B, H), f32)
    for t in range(T):                         # static unroll (T fixed)
        gates = xg[t * B:(t + 1) * B, :] + jnp.dot(
            h, enc_whh, preferred_element_type=f32)          # (B, 4H)
        s = sig(gates)                          # one full-vreg EUP pass
        u = jnp.tanh(gates)                     # one full-vreg EUP pass
        c = s[:, H:2 * H] * c + s[:, 0:H] * u[:, 2 * H:3 * H]
        h = s[:, 3 * H:4 * H] * jnp.tanh(c)

    # ---- latent -> decoder_input -> decoder input proj (folded, exact) ----
    # z is broadcast over time in the reference -> time-constant, computed once.
    dg = jnp.dot(h, e2d_w, preferred_element_type=f32) + e2d_b             # (B, 4I)

    # ---------------- decoder LSTM (input=H, hidden=I) ---------------------
    hd = jnp.zeros((B, I), f32)
    cd = jnp.zeros((B, I), f32)
    for t in range(T):                         # static unroll
        gates = dg + jnp.dot(hd, dec_whh, preferred_element_type=f32)      # (B, 4I)
        s = sig(gates)
        u = jnp.tanh(gates)
        cd = s[:, I:2 * I] * cd + s[:, 0:I] * u[:, 2 * I:3 * I]
        hd = s[:, 3 * I:4 * I] * jnp.tanh(cd)
        # per-step 16-lane store into the resident (B, T*I) output tile
        out_ref[:, t * I:(t + 1) * I] = hd.astype(out_ref.dtype)


# --------------------------- one-time weight prep -----------------------------
def prepare_params(params):
    """Fuse biases, fuse per-gate recurrent weights, fold the three
    time-constant linears (latent, decoder_input, decoder W_ih) into one,
    and pack everything into two lane-dense f32 slabs. Done ONCE, in f64."""
    H = params["enc_whh"].shape[1]
    I = params["dec_whh"].shape[1]
    f64 = np.float64

    enc_wih = np.asarray(params["enc_wih"], f64)            # (4H, I)
    enc_whh = np.asarray(params["enc_whh"], f64)            # (4H, H)
    enc_b = np.asarray(params["enc_bih"], f64) + np.asarray(params["enc_bhh"], f64)
    lat_w = np.asarray(params["lat_w"], f64)                # (L, H)
    lat_b = np.asarray(params["lat_b"], f64)                # (L,)
    din_w = np.asarray(params["din_w"], f64)                # (H, L)
    din_b = np.asarray(params["din_b"], f64)                # (H,)
    dec_wih = np.asarray(params["dec_wih"], f64)            # (4I, H)
    dec_whh = np.asarray(params["dec_whh"], f64)            # (4I, I)
    dec_b = np.asarray(params["dec_bih"], f64) + np.asarray(params["dec_bhh"], f64)

    # dg = ((h @ lat_w.T + lat_b) @ din_w.T + din_b) @ dec_wih.T + dec_b
    #    =  h @ e2d_w + e2d_b        (mathematically exact composition)
    e2d_w = lat_w.T @ din_w.T @ dec_wih.T                   # (H, 4I)
    e2d_b = (lat_b @ din_w.T + din_b) @ dec_wih.T + dec_b   # (4I,)

    # Slab A, 4H lanes wide: enc_wih^T (I rows) | enc_whh^T (H rows) | enc_b (1 row)
    slab_a = np.concatenate(
        [enc_wih.T, enc_whh.T, enc_b.reshape(1, 4 * H)], axis=0).astype(np.float32)
    # Slab B, 4I lanes wide: dec_whh^T (I rows) | e2d_w (H rows) | e2d_b (1 row)
    slab_b = np.concatenate(
        [dec_whh.T, e2d_w, e2d_b.reshape(1, 4 * I)], axis=0).astype(np.float32)
    return jnp.asarray(slab_a), jnp.asarray(slab_b)


# --------------------------- forward wrapper ----------------------------------
@jax.jit
def lstm_autoencoder_forward(x, slab_a, slab_b):
    """x: (B, T, input_size) float32 -> (B, T, input_size)."""
    B, T, I = x.shape
    H = slab_a.shape[1] // 4

    # Pad batch to a full sublane group (multiple of 8). Padded rows are zero
    # and fully independent (LSTM acts per-row), sliced off at the end.
    B_pad = max(8, ((B + 7) // 8) * 8)
    x_pad = jnp.zeros((B_pad, T, I), x.dtype).at[:B].set(x)
    # time-major, flattened: row = t*B_pad + b
    x2d = jnp.transpose(x_pad, (1, 0, 2)).reshape(T * B_pad, I)

    flops = (2 * T * B_pad * I * 4 * H            # hoisted encoder input proj
             + T * 2 * B_pad * H * 4 * H          # encoder recurrence
             + 2 * B_pad * H * 4 * I              # folded enc->dec projection
             + T * 2 * B_pad * I * 4 * I)         # decoder recurrence
    transcendentals = T * B_pad * (9 * H + 9 * I)
    bytes_accessed = 4 * (x2d.size + slab_a.size + slab_b.size + B_pad * T * I)

    vmem = pl.BlockSpec(memory_space=pltpu.MemorySpace.VMEM)
    kernel = functools.partial(_lstm_autoencoder_kernel, T=T, B=B_pad, I=I, H=H)
    out2d = pl.pallas_call(
        kernel,
        out_shape=jax.ShapeDtypeStruct((B_pad, T * I), x.dtype),
        in_specs=[vmem, vmem, vmem],
        out_specs=vmem,
        cost_estimate=pl.CostEstimate(flops=flops,
                                      transcendentals=transcendentals,
                                      bytes_accessed=bytes_accessed),
    )(x2d, slab_a, slab_b)

    return out2d.reshape(B_pad, T, I)[:B]


# --------------------------- pure-JAX reference --------------------------------
def _lstm_ref(x_seq, w_ih, w_hh, b_ih, b_hh, hidden):
    # x_seq: (B, T, in); PyTorch gate order i, f, g, o.
    B = x_seq.shape[0]
    h0 = jnp.zeros((B, hidden), jnp.float32)

    def step(carry, xt):
        h, c = carry
        gates = xt @ w_ih.T + b_ih + h @ w_hh.T + b_hh
        i, f, g, o = jnp.split(gates, 4, axis=-1)
        i, f, o = jax.nn.sigmoid(i), jax.nn.sigmoid(f), jax.nn.sigmoid(o)
        g = jnp.tanh(g)
        c = f * c + i * g
        h = o * jnp.tanh(c)
        return (h, c), h

    (h_last, _), hs = lax.scan(step, (h0, h0), jnp.transpose(x_seq, (1, 0, 2)))
    return jnp.transpose(hs, (1, 0, 2)), h_last


def lstm_autoencoder_ref(x, p):
    B, T, I = x.shape
    H = p["enc_whh"].shape[1]
    _, h_last = _lstm_ref(x, p["enc_wih"], p["enc_whh"],
                          p["enc_bih"], p["enc_bhh"], H)
    z = h_last @ p["lat_w"].T + p["lat_b"]
    z = jnp.broadcast_to(z[:, None, :], (B, T, z.shape[-1]))
    h_dec = z @ p["din_w"].T + p["din_b"]
    out, _ = _lstm_ref(h_dec, p["dec_wih"], p["dec_whh"],
                       p["dec_bih"], p["dec_bhh"], I)
    return out


# --------------------------- parameter init ------------------------------------
def init_params(key, input_size, hidden_size, latent_size):
    def u(key, shape, k):
        return jax.random.uniform(key, shape, jnp.float32, -k, k)

    keys = jax.random.split(key, 12)
    ke = 1.0 / math.sqrt(hidden_size)
    kl = 1.0 / math.sqrt(hidden_size)
    kd_in = 1.0 / math.sqrt(latent_size)
    kd = 1.0 / math.sqrt(input_size)
    I, H, L = input_size, hidden_size, latent_size
    return {
        # encoder nn.LSTM(I, H)
        "enc_wih": u(keys[0], (4 * H, I), ke),
        "enc_whh": u(keys[1], (4 * H, H), ke),
        "enc_bih": u(keys[2], (4 * H,), ke),
        "enc_bhh": u(keys[3], (4 * H,), ke),
        # latent nn.Linear(H, L)
        "lat_w": u(keys[4], (L, H), kl),
        "lat_b": u(keys[5], (L,), kl),
        # decoder_input nn.Linear(L, H)
        "din_w": u(keys[6], (H, L), kd_in),
        "din_b": u(keys[7], (H,), kd_in),
        # decoder nn.LSTM(H, I)
        "dec_wih": u(keys[8], (4 * I, H), kd),
        "dec_whh": u(keys[9], (4 * I, I), kd),
        "dec_bih": u(keys[10], (4 * I,), kd),
        "dec_bhh": u(keys[11], (4 * I,), kd),
    }


if __name__ == "__main__":
    B, T, INPUT, HIDDEN, LATENT = 2, 8, 16, 32, 8

    root = jax.random.PRNGKey(0)
    kx, kp = jax.random.split(root)
    x = jax.random.normal(kx, (B, T, INPUT), jnp.float32)
    params = init_params(kp, INPUT, HIDDEN, LATENT)

    slab_a, slab_b = prepare_params(params)            # one-time weight prep
    out = jax.block_until_ready(lstm_autoencoder_forward(x, slab_a, slab_b))
    ref = jax.block_until_ready(lstm_autoencoder_ref(x, params))

    assert out.shape == (B, T, INPUT)
    np.testing.assert_allclose(np.asarray(out), np.asarray(ref),
                               rtol=2e-5, atol=2e-5)
    print("KERNEL_OK")
</pallas_src>

<mosaic_0001>
module attributes {stable_mosaic.version = 11 : i64} {
  func.func @_lstm_autoencoder_kernel(%arg0: memref<64x16xf32, #tpu.memory_space<vmem>>, %arg1: memref<49x128xf32, #tpu.memory_space<vmem>>, %arg2: memref<49x64xf32, #tpu.memory_space<vmem>>, %arg3: memref<8x128xf32, #tpu.memory_space<vmem>>) attributes {dimension_semantics = [], scalar_prefetch = 0 : i64, scratch_operands = 0 : i64, tpu.core_type = #tpu.core_type<tc>} {
    %c0 = arith.constant 0 : index
    %c0_0 = arith.constant 0 : index
    %0 = vector.load %arg1[%c0, %c0_0] : memref<49x128xf32, #tpu.memory_space<vmem>>, vector<16x128xf32>
    %c16 = arith.constant 16 : index
    %c0_1 = arith.constant 0 : index
    %1 = vector.load %arg1[%c16, %c0_1] : memref<49x128xf32, #tpu.memory_space<vmem>>, vector<32x128xf32>
    %c48 = arith.constant 48 : index
    %c0_2 = arith.constant 0 : index
    %2 = vector.load %arg1[%c48, %c0_2] : memref<49x128xf32, #tpu.memory_space<vmem>>, vector<1x128xf32>
    %c0_3 = arith.constant 0 : index
    %c0_4 = arith.constant 0 : index
    %3 = vector.load %arg2[%c0_3, %c0_4] : memref<49x64xf32, #tpu.memory_space<vmem>>, vector<16x64xf32>
    %c16_5 = arith.constant 16 : index
    %c0_6 = arith.constant 0 : index
    %4 = vector.load %arg2[%c16_5, %c0_6] : memref<49x64xf32, #tpu.memory_space<vmem>>, vector<32x64xf32>
    %c48_7 = arith.constant 48 : index
    %c0_8 = arith.constant 0 : index
    %5 = vector.load %arg2[%c48_7, %c0_8] : memref<49x64xf32, #tpu.memory_space<vmem>>, vector<1x64xf32>
    %c0_9 = arith.constant 0 : index
    %c0_10 = arith.constant 0 : index
    %6 = vector.load %arg0[%c0_9, %c0_10] : memref<64x16xf32, #tpu.memory_space<vmem>>, vector<64x16xf32>
    %cst = arith.constant dense<0.000000e+00> : vector<64x128xf32>
    %7 = tpu.matmul %6, %0, %cst {dimension_numbers = #tpu.dot_dimension_numbers<[1], [0], [0], [1], [0, 0, 1, 1], [], []>} : vector<64x16xf32>, vector<16x128xf32>, vector<64x128xf32> -> vector<64x128xf32>
    %8 = vector.broadcast %2 : vector<1x128xf32> to vector<64x128xf32>
    %9 = arith.addf %7, %8 : vector<64x128xf32>
    %cst_11 = arith.constant 0.000000e+00 : f32
    %10 = vector.broadcast %cst_11 : f32 to vector<8x32xf32>
    %cst_12 = arith.constant 0.000000e+00 : f32
    %11 = vector.broadcast %cst_12 : f32 to vector<8x32xf32>
    %12 = vector.extract_strided_slice %9 {offsets = [0, 0], sizes = [8, 128], strides = [1, 1]} : vector<64x128xf32> to vector<8x128xf32>
    %cst_13 = arith.constant dense<0.000000e+00> : vector<8x128xf32>
    %13 = tpu.matmul %10, %1, %cst_13 {dimension_numbers = #tpu.dot_dimension_numbers<[1], [0], [0], [1], [0, 0, 1, 1], [], []>} : vector<8x32xf32>, vector<32x128xf32>, vector<8x128xf32> -> vector<8x128xf32>
    %14 = arith.addf %12, %13 : vector<8x128xf32>
    %15 = arith.negf %14 : vector<8x128xf32>
    %16 = math.exp %15 : vector<8x128xf32>
    %cst_14 = arith.constant 1.000000e+00 : f32
    %17 = vector.broadcast %cst_14 : f32 to vector<8x128xf32>
    %18 = arith.addf %17, %16 : vector<8x128xf32>
    %19 = arith.divf %17, %18 : vector<8x128xf32>
    %20 = math.tanh %14 : vector<8x128xf32>
    %21 = vector.extract_strided_slice %19 {offsets = [0, 32], sizes = [8, 32], strides = [1, 1]} : vector<8x128xf32> to vector<8x32xf32>
    %22 = arith.mulf %21, %11 : vector<8x32xf32>
    %23 = vector.extract_strided_slice %19 {offsets = [0, 0], sizes = [8, 32], strides = [1, 1]} : vector<8x128xf32> to vector<8x32xf32>
    %24 = vector.extract_strided_slice %20 {offsets = [0, 64], sizes = [8, 32], strides = [1, 1]} : vector<8x128xf32> to vector<8x32xf32>
    %25 = arith.mulf %23, %24 : vector<8x32xf32>
    %26 = arith.addf %22, %25 : vector<8x32xf32>
    %27 = vector.extract_strided_slice %19 {offsets = [0, 96], sizes = [8, 32], strides = [1, 1]} : vector<8x128xf32> to vector<8x32xf32>
    %28 = math.tanh %26 : vector<8x32xf32>
    %29 = arith.mulf %27, %28 : vector<8x32xf32>
    %30 = vector.extract_strided_slice %9 {offsets = [8, 0], sizes = [8, 128], strides = [1, 1]} : vector<64x128xf32> to vector<8x128xf32>
    %cst_15 = arith.constant dense<0.000000e+00> : vector<8x128xf32>
    %31 = tpu.matmul %29, %1, %cst_15 {dimension_numbers = #tpu.dot_dimension_numbers<[1], [0], [0], [1], [0, 0, 1, 1], [], []>} : vector<8x32xf32>, vector<32x128xf32>, vector<8x128xf32> -> vector<8x128xf32>
    %32 = arith.addf %30, %31 : vector<8x128xf32>
    %33 = arith.negf %32 : vector<8x128xf32>
    %34 = math.exp %33 : vector<8x128xf32>
    %cst_16 = arith.constant 1.000000e+00 : f32
    %35 = vector.broadcast %cst_16 : f32 to vector<8x128xf32>
    %36 = arith.addf %35, %34 : vector<8x128xf32>
    %37 = arith.divf %35, %36 : vector<8x128xf32>
    %38 = math.tanh %32 : vector<8x128xf32>
    %39 = vector.extract_strided_slice %37 {offsets = [0, 32], sizes = [8, 32], strides = [1, 1]} : vector<8x128xf32> to vector<8x32xf32>
    %40 = arith.mulf %39, %26 : vector<8x32xf32>
    %41 = vector.extract_strided_slice %37 {offsets = [0, 0], sizes = [8, 32], strides = [1, 1]} : vector<8x128xf32> to vector<8x32xf32>
    %42 = vector.extract_strided_slice %38 {offsets = [0, 64], sizes = [8, 32], strides = [1, 1]} : vector<8x128xf32> to vector<8x32xf32>
    %43 = arith.mulf %41, %42 : vector<8x32xf32>
    %44 = arith.addf %40, %43 : vector<8x32xf32>
    %45 = vector.extract_strided_slice %37 {offsets = [0, 96], sizes = [8, 32], strides = [1, 1]} : vector<8x128xf32> to vector<8x32xf32>
    %46 = math.tanh %44 : vector<8x32xf32>
    %47 = arith.mulf %45, %46 : vector<8x32xf32>
    %48 = vector.extract_strided_slice %9 {offsets = [16, 0], sizes = [8, 128], strides = [1, 1]} : vector<64x128xf32> to vector<8x128xf32>
    %cst_17 = arith.constant dense<0.000000e+00> : vector<8x128xf32>
    %49 = tpu.matmul %47, %1, %cst_17 {dimension_numbers = #tpu.dot_dimension_numbers<[1], [0], [0], [1], [0, 0, 1, 1], [], []>} : vector<8x32xf32>, vector<32x128xf32>, vector<8x128xf32> -> vector<8x128xf32>
    %50 = arith.addf %48, %49 : vector<8x128xf32>
    %51 = arith.negf %50 : vector<8x128xf32>
    %52 = math.exp %51 : vector<8x128xf32>
    %cst_18 = arith.constant 1.000000e+00 : f32
    %53 = vector.broadcast %cst_18 : f32 to vector<8x128xf32>
    %54 = arith.addf %53, %52 : vector<8x128xf32>
    %55 = arith.divf %53, %54 : vector<8x128xf32>
    %56 = math.tanh %50 : vector<8x128xf32>
    %57 = vector.extract_strided_slice %55 {offsets = [0, 32], sizes = [8, 32], strides = [1, 1]} : vector<8x128xf32> to vector<8x32xf32>
    %58 = arith.mulf %57, %44 : vector<8x32xf32>
    %59 = vector.extract_strided_slice %55 {offsets = [0, 0], sizes = [8, 32], strides = [1, 1]} : vector<8x128xf32> to vector<8x32xf32>
    %60 = vector.extract_strided_slice %56 {offsets = [0, 64], sizes = [8, 32], strides = [1, 1]} : vector<8x128xf32> to vector<8x32xf32>
    %61 = arith.mulf %59, %60 : vector<8x32xf32>
    %62 = arith.addf %58, %61 : vector<8x32xf32>
    %63 = vector.extract_strided_slice %55 {offsets = [0, 96], sizes = [8, 32], strides = [1, 1]} : vector<8x128xf32> to vector<8x32xf32>
    %64 = math.tanh %62 : vector<8x32xf32>
    %65 = arith.mulf %63, %64 : vector<8x32xf32>
    %66 = vector.extract_strided_slice %9 {offsets = [24, 0], sizes = [8, 128], strides = [1, 1]} : vector<64x128xf32> to vector<8x128xf32>
    %cst_19 = arith.constant dense<0.000000e+00> : vector<8x128xf32>
    %67 = tpu.matmul %65, %1, %cst_19 {dimension_numbers = #tpu.dot_dimension_numbers<[1], [0], [0], [1], [0, 0, 1, 1], [], []>} : vector<8x32xf32>, vector<32x128xf32>, vector<8x128xf32> -> vector<8x128xf32>
    %68 = arith.addf %66, %67 : vector<8x128xf32>
    %69 = arith.negf %68 : vector<8x128xf32>
    %70 = math.exp %69 : vector<8x128xf32>
    %cst_20 = arith.constant 1.000000e+00 : f32
    %71 = vector.broadcast %cst_20 : f32 to vector<8x128xf32>
    %72 = arith.addf %71, %70 : vector<8x128xf32>
    %73 = arith.divf %71, %72 : vector<8x128xf32>
    %74 = math.tanh %68 : vector<8x128xf32>
    %75 = vector.extract_strided_slice %73 {offsets = [0, 32], sizes = [8, 32], strides = [1, 1]} : vector<8x128xf32> to vector<8x32xf32>
    %76 = arith.mulf %75, %62 : vector<8x32xf32>
    %77 = vector.extract_strided_slice %73 {offsets = [0, 0], sizes = [8, 32], strides = [1, 1]} : vector<8x128xf32> to vector<8x32xf32>
    %78 = vector.extract_strided_slice %74 {offsets = [0, 64], sizes = [8, 32], strides = [1, 1]} : vector<8x128xf32> to vector<8x32xf32>
    %79 = arith.mulf %77, %78 : vector<8x32xf32>
    %80 = arith.addf %76, %79 : vector<8x32xf32>
    %81 = vector.extract_strided_slice %73 {offsets = [0, 96], sizes = [8, 32], strides = [1, 1]} : vector<8x128xf32> to vector<8x32xf32>
    %82 = math.tanh %80 : vector<8x32xf32>
    %83 = arith.mulf %81, %82 : vector<8x32xf32>
    %84 = vector.extract_strided_slice %9 {offsets = [32, 0], sizes = [8, 128], strides = [1, 1]} : vector<64x128xf32> to vector<8x128xf32>
    %cst_21 = arith.constant dense<0.000000e+00> : vector<8x128xf32>
    %85 = tpu.matmul %83, %1, %cst_21 {dimension_numbers = #tpu.dot_dimension_numbers<[1], [0], [0], [1], [0, 0, 1, 1], [], []>} : vector<8x32xf32>, vector<32x128xf32>, vector<8x128xf32> -> vector<8x128xf32>
    %86 = arith.addf %84, %85 : vector<8x128xf32>
    %87 = arith.negf %86 : vector<8x128xf32>
    %88 = math.exp %87 : vector<8x128xf32>
    %cst_22 = arith.constant 1.000000e+00 : f32
    %89 = vector.broadcast %cst_22 : f32 to vector<8x128xf32>
    %90 = arith.addf %89, %88 : vector<8x128xf32>
    %91 = arith.divf %89, %90 : vector<8x128xf32>
    %92 = math.tanh %86 : vector<8x128xf32>
    %93 = vector.extract_strided_slice %91 {offsets = [0, 32], sizes = [8, 32], strides = [1, 1]} : vector<8x128xf32> to vector<8x32xf32>
    %94 = arith.mulf %93, %80 : vector<8x32xf32>
    %95 = vector.extract_strided_slice %91 {offsets = [0, 0], sizes = [8, 32], strides = [1, 1]} : vector<8x128xf32> to vector<8x32xf32>
    %96 = vector.extract_strided_slice %92 {offsets = [0, 64], sizes = [8, 32], strides = [1, 1]} : vector<8x128xf32> to vector<8x32xf32>
    %97 = arith.mulf %95, %96 : vector<8x32xf32>
    %98 = arith.addf %94, %97 : vector<8x32xf32>
    %99 = vector.extract_strided_slice %91 {offsets = [0, 96], sizes = [8, 32], strides = [1, 1]} : vector<8x128xf32> to vector<8x32xf32>
    %100 = math.tanh %98 : vector<8x32xf32>
    %101 = arith.mulf %99, %100 : vector<8x32xf32>
    %102 = vector.extract_strided_slice %9 {offsets = [40, 0], sizes = [8, 128], strides = [1, 1]} : vector<64x128xf32> to vector<8x128xf32>
    %cst_23 = arith.constant dense<0.000000e+00> : vector<8x128xf32>
    %103 = tpu.matmul %101, %1, %cst_23 {dimension_numbers = #tpu.dot_dimension_numbers<[1], [0], [0], [1], [0, 0, 1, 1], [], []>} : vector<8x32xf32>, vector<32x128xf32>, vector<8x128xf32> -> vector<8x128xf32>
    %104 = arith.addf %102, %103 : vector<8x128xf32>
    %105 = arith.negf %104 : vector<8x128xf32>
    %106 = math.exp %105 : vector<8x128xf32>
    %cst_24 = arith.constant 1.000000e+00 : f32
    %107 = vector.broadcast %cst_24 : f32 to vector<8x128xf32>
    %108 = arith.addf %107, %106 : vector<8x128xf32>
    %109 = arith.divf %107, %108 : vector<8x128xf32>
    %110 = math.tanh %104 : vector<8x128xf32>
    %111 = vector.extract_strided_slice %109 {offsets = [0, 32], sizes = [8, 32], strides = [1, 1]} : vector<8x128xf32> to vector<8x32xf32>
    %112 = arith.mulf %111, %98 : vector<8x32xf32>
    %113 = vector.extract_strided_slice %109 {offsets = [0, 0], sizes = [8, 32], strides = [1, 1]} : vector<8x128xf32> to vector<8x32xf32>
    %114 = vector.extract_strided_slice %110 {offsets = [0, 64], sizes = [8, 32], strides = [1, 1]} : vector<8x128xf32> to vector<8x32xf32>
    %115 = arith.mulf %113, %114 : vector<8x32xf32>
    %116 = arith.addf %112, %115 : vector<8x32xf32>
    %117 = vector.extract_strided_slice %109 {offsets = [0, 96], sizes = [8, 32], strides = [1, 1]} : vector<8x128xf32> to vector<8x32xf32>
    %118 = math.tanh %116 : vector<8x32xf32>
    %119 = arith.mulf %117, %118 : vector<8x32xf32>
    %120 = vector.extract_strided_slice %9 {offsets = [48, 0], sizes = [8, 128], strides = [1, 1]} : vector<64x128xf32> to vector<8x128xf32>
    %cst_25 = arith.constant dense<0.000000e+00> : vector<8x128xf32>
    %121 = tpu.matmul %119, %1, %cst_25 {dimension_numbers = #tpu.dot_dimension_numbers<[1], [0], [0], [1], [0, 0, 1, 1], [], []>} : vector<8x32xf32>, vector<32x128xf32>, vector<8x128xf32> -> vector<8x128xf32>
    %122 = arith.addf %120, %121 : vector<8x128xf32>
    %123 = arith.negf %122 : vector<8x128xf32>
    %124 = math.exp %123 : vector<8x128xf32>
    %cst_26 = arith.constant 1.000000e+00 : f32
    %125 = vector.broadcast %cst_26 : f32 to vector<8x128xf32>
    %126 = arith.addf %125, %124 : vector<8x128xf32>
    %127 = arith.divf %125, %126 : vector<8x128xf32>
    %128 = math.tanh %122 : vector<8x128xf32>
    %129 = vector.extract_strided_slice %127 {offsets = [0, 32], sizes = [8, 32], strides = [1, 1]} : vector<8x128xf32> to vector<8x32xf32>
    %130 = arith.mulf %129, %116 : vector<8x32xf32>
    %131 = vector.extract_strided_slice %127 {offsets = [0, 0], sizes = [8, 32], strides = [1, 1]} : vector<8x128xf32> to vector<8x32xf32>
    %132 = vector.extract_strided_slice %128 {offsets = [0, 64], sizes = [8, 32], strides = [1, 1]} : vector<8x128xf32> to vector<8x32xf32>
    %133 = arith.mulf %131, %132 : vector<8x32xf32>
    %134 = arith.addf %130, %133 : vector<8x32xf32>
    %135 = vector.extract_strided_slice %127 {offsets = [0, 96], sizes = [8, 32], strides = [1, 1]} : vector<8x128xf32> to vector<8x32xf32>
    %136 = math.tanh %134 : vector<8x32xf32>
    %137 = arith.mulf %135, %136 : vector<8x32xf32>
    %138 = vector.extract_strided_slice %9 {offsets = [56, 0], sizes = [8, 128], strides = [1, 1]} : vector<64x128xf32> to vector<8x128xf32>
    %cst_27 = arith.constant dense<0.000000e+00> : vector<8x128xf32>
    %139 = tpu.matmul %137, %1, %cst_27 {dimension_numbers = #tpu.dot_dimension_numbers<[1], [0], [0], [1], [0, 0, 1, 1], [], []>} : vector<8x32xf32>, vector<32x128xf32>, vector<8x128xf32> -> vector<8x128xf32>
    %140 = arith.addf %138, %139 : vector<8x128xf32>
    %141 = arith.negf %140 : vector<8x128xf32>
    %142 = math.exp %141 : vector<8x128xf32>
    %cst_28 = arith.constant 1.000000e+00 : f32
    %143 = vector.broadcast %cst_28 : f32 to vector<8x128xf32>
    %144 = arith.addf %143, %142 : vector<8x128xf32>
    %145 = arith.divf %143, %144 : vector<8x128xf32>
    %146 = math.tanh %140 : vector<8x128xf32>
    %147 = vector.extract_strided_slice %145 {offsets = [0, 32], sizes = [8, 32], strides = [1, 1]} : vector<8x128xf32> to vector<8x32xf32>
    %148 = arith.mulf %147, %134 : vector<8x32xf32>
    %149 = vector.extract_strided_slice %145 {offsets = [0, 0], sizes = [8, 32], strides = [1, 1]} : vector<8x128xf32> to vector<8x32xf32>
    %150 = vector.extract_strided_slice %146 {offsets = [0, 64], sizes = [8, 32], strides = [1, 1]} : vector<8x128xf32> to vector<8x32xf32>
    %151 = arith.mulf %149, %150 : vector<8x32xf32>
    %152 = arith.addf %148, %151 : vector<8x32xf32>
    %153 = vector.extract_strided_slice %145 {offsets = [0, 96], sizes = [8, 32], strides = [1, 1]} : vector<8x128xf32> to vector<8x32xf32>
    %154 = math.tanh %152 : vector<8x32xf32>
    %155 = arith.mulf %153, %154 : vector<8x32xf32>
    %cst_29 = arith.constant dense<0.000000e+00> : vector<8x64xf32>
    %156 = tpu.matmul %155, %4, %cst_29 {dimension_numbers = #tpu.dot_dimension_numbers<[1], [0], [0], [1], [0, 0, 1, 1], [], []>} : vector<8x32xf32>, vector<32x64xf32>, vector<8x64xf32> -> vector<8x64xf32>
    %157 = vector.broadcast %5 : vector<1x64xf32> to vector<8x64xf32>
    %158 = arith.addf %156, %157 : vector<8x64xf32>
    %cst_30 = arith.constant 0.000000e+00 : f32
    %159 = vector.broadcast %cst_30 : f32 to vector<8x16xf32>
    %cst_31 = arith.constant 0.000000e+00 : f32
    %160 = vector.broadcast %cst_31 : f32 to vector<8x16xf32>
    %cst_32 = arith.constant dense<0.000000e+00> : vector<8x64xf32>
    %161 = tpu.matmul %159, %3, %cst_32 {dimension_numbers = #tpu.dot_dimension_numbers<[1], [0], [0], [1], [0, 0, 1, 1], [], []>} : vector<8x16xf32>, vector<16x64xf32>, vector<8x64xf32> -> vector<8x64xf32>
    %162 = arith.addf %158, %161 : vector<8x64xf32>
    %163 = arith.negf %162 : vector<8x64xf32>
    %164 = math.exp %163 : vector<8x64xf32>
    %cst_33 = arith.constant 1.000000e+00 : f32
    %165 = vector.broadcast %cst_33 : f32 to vector<8x64xf32>
    %166 = arith.addf %165, %164 : vector<8x64xf32>
    %167 = arith.divf %165, %166 : vector<8x64xf32>
    %168 = math.tanh %162 : vector<8x64xf32>
    %169 = vector.extract_strided_slice %167 {offsets = [0, 16], sizes = [8, 16], strides = [1, 1]} : vector<8x64xf32> to vector<8x16xf32>
    %170 = arith.mulf %169, %160 : vector<8x16xf32>
    %171 = vector.extract_strided_slice %167 {offsets = [0, 0], sizes = [8, 16], strides = [1, 1]} : vector<8x64xf32> to vector<8x16xf32>
    %172 = vector.extract_strided_slice %168 {offsets = [0, 32], sizes = [8, 16], strides = [1, 1]} : vector<8x64xf32> to vector<8x16xf32>
    %173 = arith.mulf %171, %172 : vector<8x16xf32>
    %174 = arith.addf %170, %173 : vector<8x16xf32>
    %175 = vector.extract_strided_slice %167 {offsets = [0, 48], sizes = [8, 16], strides = [1, 1]} : vector<8x64xf32> to vector<8x16xf32>
    %176 = math.tanh %174 : vector<8x16xf32>
    %177 = arith.mulf %175, %176 : vector<8x16xf32>
    %c0_34 = arith.constant 0 : index
    %c0_35 = arith.constant 0 : index
    %178 = vector.load %arg3[%c0_34, %c0_35] : memref<8x128xf32, #tpu.memory_space<vmem>>, vector<8x16xf32>
    tpu.vector_store %arg3[%c0_34, %c0_35], %177 {strides = array<i32>} : memref<8x128xf32, #tpu.memory_space<vmem>>, vector<8x16xf32>,
    %cst_36 = arith.constant dense<0.000000e+00> : vector<8x64xf32>
    %179 = tpu.matmul %177, %3, %cst_36 {dimension_numbers = #tpu.dot_dimension_numbers<[1], [0], [0], [1], [0, 0, 1, 1], [], []>} : vector<8x16xf32>, vector<16x64xf32>, vector<8x64xf32> -> vector<8x64xf32>
    %180 = arith.addf %158, %179 : vector<8x64xf32>
    %181 = arith.negf %180 : vector<8x64xf32>
    %182 = math.exp %181 : vector<8x64xf32>
    %cst_37 = arith.constant 1.000000e+00 : f32
    %183 = vector.broadcast %cst_37 : f32 to vector<8x64xf32>
    %184 = arith.addf %183, %182 : vector<8x64xf32>
    %185 = arith.divf %183, %184 : vector<8x64xf32>
    %186 = math.tanh %180 : vector<8x64xf32>
    %187 = vector.extract_strided_slice %185 {offsets = [0, 16], sizes = [8, 16], strides = [1, 1]} : vector<8x64xf32> to vector<8x16xf32>
    %188 = arith.mulf %187, %174 : vector<8x16xf32>
    %189 = vector.extract_strided_slice %185 {offsets = [0, 0], sizes = [8, 16], strides = [1, 1]} : vector<8x64xf32> to vector<8x16xf32>
    %190 = vector.extract_strided_slice %186 {offsets = [0, 32], sizes = [8, 16], strides = [1, 1]} : vector<8x64xf32> to vector<8x16xf32>
    %191 = arith.mulf %189, %190 : vector<8x16xf32>
    %192 = arith.addf %188, %191 : vector<8x16xf32>
    %193 = vector.extract_strided_slice %185 {offsets = [0, 48], sizes = [8, 16], strides = [1, 1]} : vector<8x64xf32> to vector<8x16xf32>
    %194 = math.tanh %192 : vector<8x16xf32>
    %195 = arith.mulf %193, %194 : vector<8x16xf32>
    %c0_38 = arith.constant 0 : index
    %c16_39 = arith.constant 16 : index
    %196 = vector.load %arg3[%c0_38, %c16_39] : memref<8x128xf32, #tpu.memory_space<vmem>>, vector<8x16xf32>
    tpu.vector_store %arg3[%c0_38, %c16_39], %195 {strides = array<i32>} : memref<8x128xf32, #tpu.memory_space<vmem>>, vector<8x16xf32>,
    %cst_40 = arith.constant dense<0.000000e+00> : vector<8x64xf32>
    %197 = tpu.matmul %195, %3, %cst_40 {dimension_numbers = #tpu.dot_dimension_numbers<[1], [0], [0], [1], [0, 0, 1, 1], [], []>} : vector<8x16xf32>, vector<16x64xf32>, vector<8x64xf32> -> vector<8x64xf32>
    %198 = arith.addf %158, %197 : vector<8x64xf32>
    %199 = arith.negf %198 : vector<8x64xf32>
    %200 = math.exp %199 : vector<8x64xf32>
    %cst_41 = arith.constant 1.000000e+00 : f32
    %201 = vector.broadcast %cst_41 : f32 to vector<8x64xf32>
    %202 = arith.addf %201, %200 : vector<8x64xf32>
    %203 = arith.divf %201, %202 : vector<8x64xf32>
    %204 = math.tanh %198 : vector<8x64xf32>
    %205 = vector.extract_strided_slice %203 {offsets = [0, 16], sizes = [8, 16], strides = [1, 1]} : vector<8x64xf32> to vector<8x16xf32>
    %206 = arith.mulf %205, %192 : vector<8x16xf32>
    %207 = vector.extract_strided_slice %203 {offsets = [0, 0], sizes = [8, 16], strides = [1, 1]} : vector<8x64xf32> to vector<8x16xf32>
    %208 = vector.extract_strided_slice %204 {offsets = [0, 32], sizes = [8, 16], strides = [1, 1]} : vector<8x64xf32> to vector<8x16xf32>
    %209 = arith.mulf %207, %208 : vector<8x16xf32>
    %210 = arith.addf %206, %209 : vector<8x16xf32>
    %211 = vector.extract_strided_slice %203 {offsets = [0, 48], sizes = [8, 16], strides = [1, 1]} : vector<8x64xf32> to vector<8x16xf32>
    %212 = math.tanh %210 : vector<8x16xf32>
    %213 = arith.mulf %211, %212 : vector<8x16xf32>
    %c0_42 = arith.constant 0 : index
    %c32 = arith.constant 32 : index
    %214 = vector.load %arg3[%c0_42, %c32] : memref<8x128xf32, #tpu.memory_space<vmem>>, vector<8x16xf32>
    tpu.vector_store %arg3[%c0_42, %c32], %213 {strides = array<i32>} : memref<8x128xf32, #tpu.memory_space<vmem>>, vector<8x16xf32>,
    %cst_43 = arith.constant dense<0.000000e+00> : vector<8x64xf32>
    %215 = tpu.matmul %213, %3, %cst_43 {dimension_numbers = #tpu.dot_dimension_numbers<[1], [0], [0], [1], [0, 0, 1, 1], [], []>} : vector<8x16xf32>, vector<16x64xf32>, vector<8x64xf32> -> vector<8x64xf32>
    %216 = arith.addf %158, %215 : vector<8x64xf32>
    %217 = arith.negf %216 : vector<8x64xf32>
    %218 = math.exp %217 : vector<8x64xf32>
    %cst_44 = arith.constant 1.000000e+00 : f32
    %219 = vector.broadcast %cst_44 : f32 to vector<8x64xf32>
    %220 = arith.addf %219, %218 : vector<8x64xf32>
    %221 = arith.divf %219, %220 : vector<8x64xf32>
    %222 = math.tanh %216 : vector<8x64xf32>
    %223 = vector.extract_strided_slice %221 {offsets = [0, 16], sizes = [8, 16], strides = [1, 1]} : vector<8x64xf32> to vector<8x16xf32>
    %224 = arith.mulf %223, %210 : vector<8x16xf32>
    %225 = vector.extract_strided_slice %221 {offsets = [0, 0], sizes = [8, 16], strides = [1, 1]} : vector<8x64xf32> to vector<8x16xf32>
    %226 = vector.extract_strided_slice %222 {offsets = [0, 32], sizes = [8, 16], strides = [1, 1]} : vector<8x64xf32> to vector<8x16xf32>
    %227 = arith.mulf %225, %226 : vector<8x16xf32>
    %228 = arith.addf %224, %227 : vector<8x16xf32>
    %229 = vector.extract_strided_slice %221 {offsets = [0, 48], sizes = [8, 16], strides = [1, 1]} : vector<8x64xf32> to vector<8x16xf32>
    %230 = math.tanh %228 : vector<8x16xf32>
    %231 = arith.mulf %229, %230 : vector<8x16xf32>
    %c0_45 = arith.constant 0 : index
    %c48_46 = arith.constant 48 : index
    %232 = vector.load %arg3[%c0_45, %c48_46] : memref<8x128xf32, #tpu.memory_space<vmem>>, vector<8x16xf32>
    tpu.vector_store %arg3[%c0_45, %c48_46], %231 {strides = array<i32>} : memref<8x128xf32, #tpu.memory_space<vmem>>, vector<8x16xf32>,
    %cst_47 = arith.constant dense<0.000000e+00> : vector<8x64xf32>
    %233 = tpu.matmul %231, %3, %cst_47 {dimension_numbers = #tpu.dot_dimension_numbers<[1], [0], [0], [1], [0, 0, 1, 1], [], []>} : vector<8x16xf32>, vector<16x64xf32>, vector<8x64xf32> -> vector<8x64xf32>
    %234 = arith.addf %158, %233 : vector<8x64xf32>
    %235 = arith.negf %234 : vector<8x64xf32>
    %236 = math.exp %235 : vector<8x64xf32>
    %cst_48 = arith.constant 1.000000e+00 : f32
    %237 = vector.broadcast %cst_48 : f32 to vector<8x64xf32>
    %238 = arith.addf %237, %236 : vector<8x64xf32>
    %239 = arith.divf %237, %238 : vector<8x64xf32>
    %240 = math.tanh %234 : vector<8x64xf32>
    %241 = vector.extract_strided_slice %239 {offsets = [0, 16], sizes = [8, 16], strides = [1, 1]} : vector<8x64xf32> to vector<8x16xf32>
    %242 = arith.mulf %241, %228 : vector<8x16xf32>
    %243 = vector.extract_strided_slice %239 {offsets = [0, 0], sizes = [8, 16], strides = [1, 1]} : vector<8x64xf32> to vector<8x16xf32>
    %244 = vector.extract_strided_slice %240 {offsets = [0, 32], sizes = [8, 16], strides = [1, 1]} : vector<8x64xf32> to vector<8x16xf32>
    %245 = arith.mulf %243, %244 : vector<8x16xf32>
    %246 = arith.addf %242, %245 : vector<8x16xf32>
    %247 = vector.extract_strided_slice %239 {offsets = [0, 48], sizes = [8, 16], strides = [1, 1]} : vector<8x64xf32> to vector<8x16xf32>
    %248 = math.tanh %246 : vector<8x16xf32>
    %249 = arith.mulf %247, %248 : vector<8x16xf32>
    %c0_49 = arith.constant 0 : index
    %c64 = arith.constant 64 : index
    %250 = vector.load %arg3[%c0_49, %c64] : memref<8x128xf32, #tpu.memory_space<vmem>>, vector<8x16xf32>
    tpu.vector_store %arg3[%c0_49, %c64], %249 {strides = array<i32>} : memref<8x128xf32, #tpu.memory_space<vmem>>, vector<8x16xf32>,
    %cst_50 = arith.constant dense<0.000000e+00> : vector<8x64xf32>
    %251 = tpu.matmul %249, %3, %cst_50 {dimension_numbers = #tpu.dot_dimension_numbers<[1], [0], [0], [1], [0, 0, 1, 1], [], []>} : vector<8x16xf32>, vector<16x64xf32>, vector<8x64xf32> -> vector<8x64xf32>
    %252 = arith.addf %158, %251 : vector<8x64xf32>
    %253 = arith.negf %252 : vector<8x64xf32>
    %254 = math.exp %253 : vector<8x64xf32>
    %cst_51 = arith.constant 1.000000e+00 : f32
    %255 = vector.broadcast %cst_51 : f32 to vector<8x64xf32>
    %256 = arith.addf %255, %254 : vector<8x64xf32>
    %257 = arith.divf %255, %256 : vector<8x64xf32>
    %258 = math.tanh %252 : vector<8x64xf32>
    %259 = vector.extract_strided_slice %257 {offsets = [0, 16], sizes = [8, 16], strides = [1, 1]} : vector<8x64xf32> to vector<8x16xf32>
    %260 = arith.mulf %259, %246 : vector<8x16xf32>
    %261 = vector.extract_strided_slice %257 {offsets = [0, 0], sizes = [8, 16], strides = [1, 1]} : vector<8x64xf32> to vector<8x16xf32>
    %262 = vector.extract_strided_slice %258 {offsets = [0, 32], sizes = [8, 16], strides = [1, 1]} : vector<8x64xf32> to vector<8x16xf32>
    %263 = arith.mulf %261, %262 : vector<8x16xf32>
    %264 = arith.addf %260, %263 : vector<8x16xf32>
    %265 = vector.extract_strided_slice %257 {offsets = [0, 48], sizes = [8, 16], strides = [1, 1]} : vector<8x64xf32> to vector<8x16xf32>
    %266 = math.tanh %264 : vector<8x16xf32>
    %267 = arith.mulf %265, %266 : vector<8x16xf32>
    %c0_52 = arith.constant 0 : index
    %c80 = arith.constant 80 : index
    %268 = vector.load %arg3[%c0_52, %c80] : memref<8x128xf32, #tpu.memory_space<vmem>>, vector<8x16xf32>
    tpu.vector_store %arg3[%c0_52, %c80], %267 {strides = array<i32>} : memref<8x128xf32, #tpu.memory_space<vmem>>, vector<8x16xf32>,
    %cst_53 = arith.constant dense<0.000000e+00> : vector<8x64xf32>
    %269 = tpu.matmul %267, %3, %cst_53 {dimension_numbers = #tpu.dot_dimension_numbers<[1], [0], [0], [1], [0, 0, 1, 1], [], []>} : vector<8x16xf32>, vector<16x64xf32>, vector<8x64xf32> -> vector<8x64xf32>
    %270 = arith.addf %158, %269 : vector<8x64xf32>
    %271 = arith.negf %270 : vector<8x64xf32>
    %272 = math.exp %271 : vector<8x64xf32>
    %cst_54 = arith.constant 1.000000e+00 : f32
    %273 = vector.broadcast %cst_54 : f32 to vector<8x64xf32>
    %274 = arith.addf %273, %272 : vector<8x64xf32>
    %275 = arith.divf %273, %274 : vector<8x64xf32>
    %276 = math.tanh %270 : vector<8x64xf32>
    %277 = vector.extract_strided_slice %275 {offsets = [0, 16], sizes = [8, 16], strides = [1, 1]} : vector<8x64xf32> to vector<8x16xf32>
    %278 = arith.mulf %277, %264 : vector<8x16xf32>
    %279 = vector.extract_strided_slice %275 {offsets = [0, 0], sizes = [8, 16], strides = [1, 1]} : vector<8x64xf32> to vector<8x16xf32>
    %280 = vector.extract_strided_slice %276 {offsets = [0, 32], sizes = [8, 16], strides = [1, 1]} : vector<8x64xf32> to vector<8x16xf32>
    %281 = arith.mulf %279, %280 : vector<8x16xf32>
    %282 = arith.addf %278, %281 : vector<8x16xf32>
    %283 = vector.extract_strided_slice %275 {offsets = [0, 48], sizes = [8, 16], strides = [1, 1]} : vector<8x64xf32> to vector<8x16xf32>
    %284 = math.tanh %282 : vector<8x16xf32>
    %285 = arith.mulf %283, %284 : vector<8x16xf32>
    %c0_55 = arith.constant 0 : index
    %c96 = arith.constant 96 : index
    %286 = vector.load %arg3[%c0_55, %c96] : memref<8x128xf32, #tpu.memory_space<vmem>>, vector<8x16xf32>
    tpu.vector_store %arg3[%c0_55, %c96], %285 {strides = array<i32>} : memref<8x128xf32, #tpu.memory_space<vmem>>, vector<8x16xf32>,
    %cst_56 = arith.constant dense<0.000000e+00> : vector<8x64xf32>
    %287 = tpu.matmul %285, %3, %cst_56 {dimension_numbers = #tpu.dot_dimension_numbers<[1], [0], [0], [1], [0, 0, 1, 1], [], []>} : vector<8x16xf32>, vector<16x64xf32>, vector<8x64xf32> -> vector<8x64xf32>
    %288 = arith.addf %158, %287 : vector<8x64xf32>
    %289 = arith.negf %288 : vector<8x64xf32>
    %290 = math.exp %289 : vector<8x64xf32>
    %cst_57 = arith.constant 1.000000e+00 : f32
    %291 = vector.broadcast %cst_57 : f32 to vector<8x64xf32>
    %292 = arith.addf %291, %290 : vector<8x64xf32>
    %293 = arith.divf %291, %292 : vector<8x64xf32>
    %294 = math.tanh %288 : vector<8x64xf32>
    %295 = vector.extract_strided_slice %293 {offsets = [0, 16], sizes = [8, 16], strides = [1, 1]} : vector<8x64xf32> to vector<8x16xf32>
    %296 = arith.mulf %295, %282 : vector<8x16xf32>
    %297 = vector.extract_strided_slice %293 {offsets = [0, 0], sizes = [8, 16], strides = [1, 1]} : vector<8x64xf32> to vector<8x16xf32>
    %298 = vector.extract_strided_slice %294 {offsets = [0, 32], sizes = [8, 16], strides = [1, 1]} : vector<8x64xf32> to vector<8x16xf32>
    %299 = arith.mulf %297, %298 : vector<8x16xf32>
    %300 = arith.addf %296, %299 : vector<8x16xf32>
    %301 = vector.extract_strided_slice %293 {offsets = [0, 48], sizes = [8, 16], strides = [1, 1]} : vector<8x64xf32> to vector<8x16xf32>
    %302 = math.tanh %300 : vector<8x16xf32>
    %303 = arith.mulf %301, %302 : vector<8x16xf32>
    %c0_58 = arith.constant 0 : index
    %c112 = arith.constant 112 : index
    %304 = vector.load %arg3[%c0_58, %c112] : memref<8x128xf32, #tpu.memory_space<vmem>>, vector<8x16xf32>
    tpu.vector_store %arg3[%c0_58, %c112], %303 {strides = array<i32>} : memref<8x128xf32, #tpu.memory_space<vmem>>, vector<8x16xf32>,
    return
  }
}

</mosaic_0001>

<bundles_post_ra>
// kernel: lstm_autoencoder_forward.1
= control target key start
LH: loop header
LB: loop body
LE: loop exit
PB: predicated region body
PF: predicated region fallthrough
CT: control target
= control target key end

     0   :  { %v2395_v0 = vmov 0.0|0.0   ;;  %vm40_vm0 = vcmask 130048   ;;  %vm2396_vm1 = vmmov 0   ;;  %v2397_v4 = vmov 0.0   ;;  %s2398_s30 = smov 64   ;;  %s2400_s29 = smov 96   ;;  %s2746_s1 = inlined_call_operand.vmem [shape: f32[49,128], index: 1, kind: input, shape index: {}]   ;;  %s2747_s0 = inlined_call_operand.vmem [shape: f32[64,16], index: 0, kind: input, shape index: {}]   ;;  %s2748_s2 = inlined_call_operand.vmem [shape: f32[49,64], index: 2, kind: input, shape index: {}]   ;;  %s2749_s3 = inlined_call_operand.vmem [shape: f32[8,128], index: 3, kind: output, shape index: {}]  }
   0x1   :  { %2179 = vmatprep.subr.bf16.mxu1 %v2395_v0  ;;  %v14_v1 = vld [vmem:[%s2746_s1] sm:$0xff]  ;;  %v15_v2 = vld [vmem:[%s2746_s1 + $0x8] sm:$0xff]  ;;  %v16_v3 = vld [vmem:[%s2746_s1 + $0x10] sm:$0xff]  ;;  %2028 = vmatprep.mubr.msk.f32.mxu1 %vm2396_vm1, %v2397_v4  ;;  %vm170_vm2 = vcmask 261120   ;;  %s2402_s4 = smov 80   ;;  %s2403_s7 = smov 48  }
   0x2   :  { %v17_v5 = vld [vmem:[%s2746_s1 + $0x18] sm:$0xff]  ;;  %v18_v6 = vld [vmem:[%s2746_s1 + $0x20] sm:$0xff]  ;;  %v19_v7 = vld [vmem:[%s2746_s1 + $0x28] sm:$0xff]  ;;  %v2175_v8 = vpack.c.bf16 %v15_v2, %v14_v1  ;;  %vm1251_vm3 = vcmask 261248   ;;  %s2404_s10 = smov 112   ;;  %vm1356_vm4 = vcmask 392448  }
   0x3   :  { %v2446_v9 = vpack.c.bf16 %v17_v5, %v16_v3  ;;  %v28_v10 = vld [vmem:[%s2747_s0] sm:$0xff]  ;;  %v2452_v11 = vpack.c.bf16 %v19_v7, %v18_v6  ;;  %v29_v12 = vld [vmem:[%s2747_s0 + $0x8] sm:$0xff]  ;;  %v2477_v13 = vld [vmem:[%s2746_s1 + $0x30] ss:$0 sm:$0xff]  ;;  %s2399_s1 = smov 32   ;;  %vm1457_vm5 = vcmask 523648  }
   0x4   :  { %2176 = vmatprep.subr.bf16.mxu0 %v2175_v8  ;;  %2008 = vmatprep.mubr.msk.f32.mxu0 %vm40_vm0, %v28_v10  ;;  %v30_v48 = vld [vmem:[%s2747_s0 + $0x10] sm:$0xff]  ;;  %v31_v49 = vld [vmem:[%s2747_s0 + $0x18] sm:$0xff]  ;;  %v32_v50 = vld [vmem:[%s2747_s0 + $0x20] sm:$0xff]  ;;  %vm1563_vm6 = vcmask 654848   ;;  %vm1668_vm7 = vcmask 786048   ;;  %vm1773_vm8 = vcmask 917248  }
   0x5   :  { %2181 = vmatpush3.bf16.msra.mxu1 %v2446_v9  ;;  %2178 = vmatpush3.bf16.msra.mxu0 %v2175_v8  ;;  %v33_v51 = vld [vmem:[%s2747_s0 + $0x28] sm:$0xff]  ;;  %v34_v52 = vld [vmem:[%s2747_s0 + $0x30] sm:$0xff]  ;;  %v35_v53 = vld [vmem:[%s2747_s0 + $0x38] sm:$0xff]  ;;  %vm1878_vm9 = vcmask 1048448  }
   0x6   :  { %2182 = vmatprep.subr.bf16.mxu1 %v2395_v0  ;;  %2191 = vmatprep.subr.bf16.mxu0 %v2395_v0 }
   0x8   :  { %2009 = vmatmul.mubr.msk.f32.vlgmr.msra.gmra.mrb[0].mxu0 %vm40_vm0, %v29_v12 }
   0x9   :  { %2184 = vmatpush3.bf16.msra.mxu1 %v2452_v11  ;;  %2193 = vmatpush3.bf16.msra.mxu0 %v2446_v9 }
   0xa   :  { %2185 = vmatprep.subr.bf16.mxu1 %v2395_v0  ;;  %2194 = vmatprep.subr.bf16.mxu0 %v2395_v0 }
   0xb   :  { %2011 = vmatprep.mubr.msk.f32.mxu0 %vm40_vm0, %v30_v48 }
   0xc   :  { %2029 = vmatmul.mubr.f32.vlgmr.msra.gmra.mrb[0].mxu1 %v2397_v4  ;;  %2012 = vmatmul.mubr.msk.f32.gmra.mrb[2].mxu0 %vm40_vm0, %v31_v49 }
   0xd   :  { %2187 = vmatpush3.bf16.msra.mxu1 %v2446_v9  ;;  %2039 = vmatprep.mubr.msk.f32.mxu1 %vm2396_vm1, %v2397_v4 }
   0xe   :  { %2188 = vmatprep.subr.bf16.mxu1 %v2395_v0  ;;  %2196 = vmatpush3.bf16.msra.mxu0 %v2452_v11 }
   0xf   :  { %2203 = vmatprep.subr.bf16.mxu0 %v2395_v0  ;;  %2014 = vmatprep.mubr.msk.f32.mxu0 %vm40_vm0, %v32_v50 }
  0x10   :  { %2015 = vmatmul.mubr.msk.f32.gmra.mrb[4].mxu0 %vm40_vm0, %v33_v51 }
  0x11   :  { %2190 = vmatpush3.bf16.msra.mxu1 %v2452_v11  ;;  %2017 = vmatprep.mubr.msk.f32.mxu0 %vm40_vm0, %v34_v52 }
  0x12   :  { %2197 = vmatprep.subr.bf16.mxu1 %v2395_v0 }
  0x14   :  { %2018 = vmatmul.mubr.msk.f32.gmra.mrb[6].mxu0 %vm40_vm0, %v35_v53 }
  0x15   :  { %2050 = vmatprep.mubr.msk.f32.mxu0 %vm2396_vm1, %v2397_v4 }
  0xdb   :  { %v2010_v14 = vpop.f32.mrb[0].mxu0 }
  0xdc   :  { %v131_v15 = vpop.f32.mrb[1].mxu0  ;;  %v137_v34 = vadd.f32 %v2010_v14, %v2477_v13 }
  0xdd   :  { %v132_v16 = vadd.f32 %v2477_v13, %v131_v15 }
  0xdf   :  { %v240_v17 = vpop.f32.mrb[0].mxu1  ;;  %v2013_v57 = vpop.f32.mrb[2].mxu0 }
  0xe0   :  { %v244_v18 = vadd.f32 %v240_v17, %v132_v16  ;;  %v2030_v19 = vpop.f32.mrb[1].mxu1  ;;  %v141_v58 = vpop.f32.mrb[3].mxu0 }
  0xe1   :  { %v142_v1 = vadd.f32 %v2477_v13, %v141_v58 }
  0xe2   :  { %2267 = vtanh.f32 %v244_v18  ;;  %v1893_v21 = vmul.f32 -1.442695, %v244_v18 }
  0xe3   :  { %v2522_v59 = vpop.f32.mrb[4].mxu0 }
  0xe4   :  { %2269 = vpow2.f32 %v1893_v21  ;;  %v2524_v60 = vpop.f32.mrb[5].mxu0 }
  0xe7   :  { %v2526_v61 = vpop.f32.mrb[6].mxu0 }
  0xe8   :  { %v2528_v62 = vpop.f32.mrb[7].mxu0 }
  0xec   :  { %v2268_v20 = vpop.eup %2267 }
  0xed   :  { %254 = vrot.lane.b32.xlu0 %v2268_v20, %s2398_s30 }
  0xee   :  { %v2270_v22 = vpop.eup %2269 }
  0xef   :  { %v248_v23 = vadd.f32 1.0, %v2270_v22 }
  0xf1   :  { %2271 = vrcp.f32 %v248_v23  ;;  %v147_v23 = vadd.f32 %v2013_v57, %v2477_v13 }
  0xfb   :  { %v2272_v24 = vpop.eup %2271 }
  0xfc   :  { %v252_v27 = vmul.f32 0.0, %v2272_v24 }
 0x15f   :  { %v255_v25 = vpop.permute.xlu0 %254 }
 0x160   :  { %v257_v26 = vmul.f32 %v2272_v24, %v255_v25 }
 0x162   :  { %259 = vrot.lane.b32.xlu0 %v257_v26, %s2399_s1 }
 0x1d4   :  { %v260_v28 = vpop.permute.xlu0 %259 }
 0x1d5   :  { %v262_v29 = vadd.f32 %v260_v28, %v252_v27 }
 0x1d7   :  { %2273 = vtanh.f32 %v262_v29 }
 0x1e1   :  { %v2274_v30 = vpop.eup %2273 }
 0x1e2   :  { %265 = vrot.lane.b32.xlu1 %v2274_v30, %s2398_s30 }
 0x254   :  { %v266_v31 = vpop.permute.xlu1 %265 }
 0x255   :  { %v268_v32 = vmul.f32 %v2272_v24, %v266_v31 }
 0x257   :  { %270 = vrot.lane.b32.xlu1 %v268_v32, %s2399_s1 }
 0x2c9   :  { %v271_v33 = vpop.permute.xlu1 %270 }
 0x2ca   :  { %2040 = vmatmul.mubr.msk.f32.vlgmr.msra.gmra.mrb[2].mxu1 %vm170_vm2, %v271_v33 }
 0x2cb   :  { %2199 = vmatpush3.bf16.msra.mxu1 %v2446_v9  ;;  %2061 = vmatprep.mubr.msk.f32.mxu1 %vm2396_vm1, %v2397_v4 }
 0x2cc   :  { %2200 = vmatprep.subr.bf16.mxu1 %v2395_v0 }
 0x2cf   :  { %2202 = vmatpush3.bf16.msra.mxu1 %v2452_v11 }
 0x2d0   :  { %2209 = vmatprep.subr.bf16.mxu1 %v2395_v0 }
 0x39d   :  { %v340_v35 = vpop.f32.mrb[2].mxu1 }
 0x39e   :  { %v344_v36 = vadd.f32 %v340_v35, %v137_v34  ;;  %v2041_v37 = vpop.f32.mrb[3].mxu1 }
 0x3a0   :  { %2275 = vtanh.f32 %v344_v36  ;;  %v1895_v39 = vmul.f32 -1.442695, %v344_v36 }
 0x3a2   :  { %2277 = vpow2.f32 %v1895_v39 }
 0x3aa   :  { %v2276_v38 = vpop.eup %2275 }
 0x3ab   :  { %354 = vrot.lane.b32.xlu0 %v2276_v38, %s2398_s30 }
 0x3ac   :  { %v2278_v40 = vpop.eup %2277 }
 0x3ad   :  { %v348_v41 = vadd.f32 1.0, %v2278_v40 }
 0x3af   :  { %2279 = vrcp.f32 %v348_v41  ;;  %v152_v41 = vadd.f32 %v2477_v13, %v2524_v60  ;;  %v157_v60 = vadd.f32 %v2522_v59, %v2477_v13 }
 0x3b9   :  { %v2280_v42 = vpop.eup %2279 }
 0x3ba   :  { %v352_v45 = vmul.f32 %v2280_v42, %v262_v29 }
 0x41d   :  { %v355_v43 = vpop.permute.xlu0 %354 }
 0x41e   :  { %v357_v44 = vmul.f32 %v2280_v42, %v355_v43 }
 0x420   :  { %359 = vrot.lane.b32.xlu1 %v357_v44, %s2399_s1 }
 0x492   :  { %v360_v46 = vpop.permute.xlu1 %359 }
 0x493   :  { %v362_v47 = vadd.f32 %v360_v46, %v352_v45 }
 0x495   :  { %2281 = vtanh.f32 %v362_v47 }
 0x49f   :  { %v2282_v54 = vpop.eup %2281 }
 0x4a0   :  { %365 = vrot.lane.b32.xlu0 %v2282_v54, %s2398_s30 }
 0x512   :  { %v366_v55 = vpop.permute.xlu0 %365 }
 0x513   :  { %v368_v56 = vmul.f32 %v2280_v42, %v366_v55 }
 0x515   :  { %370 = vrot.lane.b32.xlu1 %v368_v56, %s2399_s1 }
 0x587   :  { %v371_v63 = vpop.permute.xlu1 %370 }
 0x588   :  { %2051 = vmatmul.mubr.msk.f32.vlgmr.msra.gmra.mrb[8].mxu0 %vm170_vm2, %v371_v63 }
 0x589   :  { %2205 = vmatpush3.bf16.msra.mxu0 %v2446_v9  ;;  %2072 = vmatprep.mubr.msk.f32.mxu0 %vm2396_vm1, %v2397_v4 }
 0x58a   :  { %2206 = vmatprep.subr.bf16.mxu0 %v2395_v0 }
 0x58d   :  { %2208 = vmatpush3.bf16.msra.mxu0 %v2452_v11 }
 0x58e   :  { %2215 = vmatprep.subr.bf16.mxu0 %v2395_v0 }
 0x65b   :  { %v440_v2 = vpop.f32.mrb[8].mxu0 }
 0x65c   :  { %v444_v3 = vadd.f32 %v440_v2, %v142_v1  ;;  %v2052_v5 = vpop.f32.mrb[9].mxu0 }
 0x65e   :  { %2283 = vtanh.f32 %v444_v3  ;;  %v1897_v7 = vmul.f32 -1.442695, %v444_v3 }
 0x660   :  { %2285 = vpow2.f32 %v1897_v7 }
 0x668   :  { %v2284_v6 = vpop.eup %2283 }
 0x669   :  { %454 = vrot.lane.b32.xlu0 %v2284_v6, %s2398_s30 }
 0x66a   :  { %v2286_v8 = vpop.eup %2285 }
 0x66b   :  { %v448_v10 = vadd.f32 1.0, %v2286_v8 }
 0x66d   :  { %2287 = vrcp.f32 %v448_v10 }
 0x677   :  { %v2288_v12 = vpop.eup %2287 }
 0x678   :  { %v452_v16 = vmul.f32 %v2288_v12, %v362_v47 }
 0x6db   :  { %v455_v14 = vpop.permute.xlu0 %454 }
 0x6dc   :  { %v457_v15 = vmul.f32 %v2288_v12, %v455_v14 }
 0x6de   :  { %459 = vrot.lane.b32.xlu1 %v457_v15, %s2399_s1 }
 0x750   :  { %v460_v17 = vpop.permute.xlu1 %459 }
 0x751   :  { %v462_v18 = vadd.f32 %v460_v17, %v452_v16 }
 0x753   :  { %2289 = vtanh.f32 %v462_v18 }
 0x75d   :  { %v2290_v19 = vpop.eup %2289 }
 0x75e   :  { %465 = vrot.lane.b32.xlu0 %v2290_v19, %s2398_s30 }
 0x7d0   :  { %v466_v20 = vpop.permute.xlu0 %465 }
 0x7d1   :  { %v468_v21 = vmul.f32 %v2288_v12, %v466_v20 }
 0x7d3   :  { %470 = vrot.lane.b32.xlu1 %v468_v21, %s2399_s1 }
 0x845   :  { %v471_v22 = vpop.permute.xlu1 %470 }
 0x846   :  { %2062 = vmatmul.mubr.msk.f32.vlgmr.msra.gmra.mrb[4].mxu1 %vm170_vm2, %v471_v22 }
 0x847   :  { %2211 = vmatpush3.bf16.msra.mxu1 %v2446_v9  ;;  %2083 = vmatprep.mubr.msk.f32.mxu1 %vm2396_vm1, %v2397_v4 }
 0x848   :  { %2212 = vmatprep.subr.bf16.mxu1 %v2395_v0 }
 0x84b   :  { %2214 = vmatpush3.bf16.msra.mxu1 %v2452_v11 }
 0x84c   :  { %2221 = vmatprep.subr.bf16.mxu1 %v2395_v0 }
 0x919   :  { %v540_v24 = vpop.f32.mrb[4].mxu1 }
 0x91a   :  { %v544_v25 = vadd.f32 %v540_v24, %v147_v23  ;;  %v2063_v26 = vpop.f32.mrb[5].mxu1 }
 0x91c   :  { %2291 = vtanh.f32 %v544_v25  ;;  %v1899_v28 = vmul.f32 -1.442695, %v544_v25 }
 0x91e   :  { %2293 = vpow2.f32 %v1899_v28 }
 0x926   :  { %v2292_v27 = vpop.eup %2291 }
 0x927   :  { %554 = vrot.lane.b32.xlu0 %v2292_v27, %s2398_s30 }
 0x928   :  { %v2294_v29 = vpop.eup %2293 }
 0x929   :  { %v548_v30 = vadd.f32 1.0, %v2294_v29 }
 0x92b   :  { %2295 = vrcp.f32 %v548_v30 }
 0x935   :  { %v2296_v31 = vpop.eup %2295 }
 0x936   :  { %v552_v34 = vmul.f32 %v2296_v31, %v462_v18  ;;  %v162_v18 = vadd.f32 %v2477_v13, %v2528_v62 }
 0x999   :  { %v555_v32 = vpop.permute.xlu0 %554 }
 0x99a   :  { %v557_v33 = vmul.f32 %v2296_v31, %v555_v32 }
 0x99c   :  { %559 = vrot.lane.b32.xlu1 %v557_v33, %s2399_s1 }
 0xa0e   :  { %v560_v35 = vpop.permute.xlu1 %559 }
 0xa0f   :  { %v562_v36 = vadd.f32 %v560_v35, %v552_v34  ;;  %v167_v35 = vadd.f32 %v2526_v61, %v2477_v13  ;;  %v23_v61 = vld [vmem:[%s2748_s2 + $0x10] sm:$0xff] }
 0xa11   :  { %2297 = vtanh.f32 %v562_v36 }
 0xa1b   :  { %v2298_v37 = vpop.eup %2297 }
 0xa1c   :  { %565 = vrot.lane.b32.xlu0 %v2298_v37, %s2398_s30 }
 0xa8e   :  { %v566_v38 = vpop.permute.xlu0 %565 }
 0xa8f   :  { %v568_v39 = vmul.f32 %v2296_v31, %v566_v38 }
 0xa91   :  { %570 = vrot.lane.b32.xlu1 %v568_v39, %s2399_s1 }
 0xb03   :  { %v571_v40 = vpop.permute.xlu1 %570 }
 0xb04   :  { %2073 = vmatmul.mubr.msk.f32.vlgmr.msra.gmra.mrb[10].mxu0 %vm170_vm2, %v571_v40 }
 0xb05   :  { %2217 = vmatpush3.bf16.msra.mxu0 %v2446_v9  ;;  %2094 = vmatprep.mubr.msk.f32.mxu0 %vm2396_vm1, %v2397_v4 }
 0xb06   :  { %2218 = vmatprep.subr.bf16.mxu0 %v2395_v0 }
 0xb09   :  { %2220 = vmatpush3.bf16.msra.mxu0 %v2452_v11 }
 0xb0a   :  { %2227 = vmatprep.subr.bf16.mxu0 %v2395_v0 }
 0xbd7   :  { %v640_v42 = vpop.f32.mrb[10].mxu0 }
 0xbd8   :  { %v644_v43 = vadd.f32 %v640_v42, %v152_v41  ;;  %v2074_v44 = vpop.f32.mrb[11].mxu0 }
 0xbda   :  { %2299 = vtanh.f32 %v644_v43  ;;  %v1901_v46 = vmul.f32 -1.442695, %v644_v43 }
 0xbdc   :  { %2301 = vpow2.f32 %v1901_v46 }
 0xbe4   :  { %v2300_v45 = vpop.eup %2299 }
 0xbe5   :  { %654 = vrot.lane.b32.xlu0 %v2300_v45, %s2398_s30 }
 0xbe6   :  { %v2302_v47 = vpop.eup %2301 }
 0xbe7   :  { %v648_v48 = vadd.f32 1.0, %v2302_v47 }
 0xbe9   :  { %2303 = vrcp.f32 %v648_v48  ;;  %v24_v48 = vld [vmem:[%s2748_s2 + $0x18] sm:$0xff] }
 0xbf3   :  { %v2304_v49 = vpop.eup %2303 }
 0xbf4   :  { %v652_v52 = vmul.f32 %v2304_v49, %v562_v36 }
 0xc57   :  { %v655_v50 = vpop.permute.xlu0 %654 }
 0xc58   :  { %v657_v51 = vmul.f32 %v2304_v49, %v655_v50  ;;  %v2228_v50 = vpack.c.bf16 %v24_v48, %v23_v61 }
 0xc5a   :  { %659 = vrot.lane.b32.xlu1 %v657_v51, %s2399_s1  ;;  %v26_v51 = vld [vmem:[%s2748_s2 + $0x28] sm:$0xff] }
 0xccc   :  { %v660_v53 = vpop.permute.xlu1 %659 }
 0xccd   :  { %v662_v54 = vadd.f32 %v660_v53, %v652_v52  ;;  %v21_v52 = vld [vmem:[%s2748_s2] sm:$0xff]  ;;  %v22_v53 = vld [vmem:[%s2748_s2 + $0x8] sm:$0xff] }
 0xccf   :  { %2305 = vtanh.f32 %v662_v54 }
 0xcd9   :  { %v2306_v55 = vpop.eup %2305 }
 0xcda   :  { %665 = vrot.lane.b32.xlu0 %v2306_v55, %s2398_s30 }
 0xd4c   :  { %v666_v56 = vpop.permute.xlu0 %665 }
 0xd4d   :  { %v668_v57 = vmul.f32 %v2304_v49, %v666_v56  ;;  %v25_v49 = vld [vmem:[%s2748_s2 + $0x20] sm:$0xff] }
 0xd4e   :  { %v2231_v55 = vpack.c.bf16 %v26_v51, %v25_v49 }
 0xd4f   :  { %670 = vrot.lane.b32.xlu1 %v668_v57, %s2399_s1 }
 0xdc1   :  { %v671_v58 = vpop.permute.xlu1 %670 }
 0xdc2   :  { %2084 = vmatmul.mubr.msk.f32.vlgmr.msra.gmra.mrb[6].mxu1 %vm170_vm2, %v671_v58 }
 0xdc3   :  { %2223 = vmatpush3.bf16.msra.mxu1 %v2446_v9  ;;  %2105 = vmatprep.mubr.msk.f32.mxu1 %vm2396_vm1, %v2397_v4 }
 0xdc4   :  { %2224 = vmatprep.subr.bf16.mxu1 %v2395_v0 }
 0xdc7   :  { %2226 = vmatpush3.bf16.msra.mxu1 %v2452_v11 }
 0xdc8   :  { %2233 = vmatprep.subr.bf16.mxu1 %v2395_v0 }
 0xe95   :  { %v740_v63 = vpop.f32.mrb[6].mxu1 }
 0xe96   :  { %v744_v1 = vadd.f32 %v740_v63, %v157_v60  ;;  %v2085_v2 = vpop.f32.mrb[7].mxu1 }
 0xe97   :  { %v1908_v2 = vld [vmem:[%s2748_s2 + $0x30] ss:$0 sm:$0xff]  ;;  %s2401_s2 = smov 16  }
 0xe98   :  { %2307 = vtanh.f32 %v744_v1  ;;  %v1903_v9 = vmul.f32 -1.442695, %v744_v1 }
 0xe9a   :  { %2309 = vpow2.f32 %v1903_v9 }
 0xea2   :  { %v2308_v3 = vpop.eup %2307 }
 0xea3   :  { %754 = vrot.lane.b32.xlu0 %v2308_v3, %s2398_s30 }
 0xea4   :  { %v2310_v5 = vpop.eup %2309 }
 0xea5   :  { %v748_v6 = vadd.f32 1.0, %v2310_v5 }
 0xea7   :  { %2311 = vrcp.f32 %v748_v6 }
 0xeb1   :  { %v2312_v7 = vpop.eup %2311 }
 0xeb2   :  { %v752_v10 = vmul.f32 %v2312_v7, %v662_v54  ;;  %v2614_v54 = vpack.c.bf16 %v22_v53, %v21_v52 }
 0xf15   :  { %v755_v8 = vpop.permute.xlu0 %754 }
 0xf16   :  { %v757_v11 = vmul.f32 %v2312_v7, %v755_v8 }
 0xf18   :  { %759 = vrot.lane.b32.xlu1 %v757_v11, %s2399_s1 }
 0xf8a   :  { %v760_v12 = vpop.permute.xlu1 %759 }
 0xf8b   :  { %v762_v59 = vadd.f32 %v760_v12, %v752_v10 }
 0xf8d   :  { %2313 = vtanh.f32 %v762_v59 }
 0xf97   :  { %v2314_v14 = vpop.eup %2313 }
 0xf98   :  { %765 = vrot.lane.b32.xlu0 %v2314_v14, %s2398_s30 }
0x100a   :  { %v766_v15 = vpop.permute.xlu0 %765 }
0x100b   :  { %v768_v16 = vmul.f32 %v2312_v7, %v766_v15 }
0x100d   :  { %770 = vrot.lane.b32.xlu1 %v768_v16, %s2399_s1 }
0x107f   :  { %v771_v17 = vpop.permute.xlu1 %770 }
0x1080   :  { %2095 = vmatmul.mubr.msk.f32.vlgmr.msra.gmra.mrb[12].mxu0 %vm170_vm2, %v771_v17 }
0x1081   :  { %2116 = vmatprep.mubr.msk.f32.mxu0 %vm2396_vm1, %v2397_v4  ;;  %2229 = vmatpush3.bf16.msra.mxu0 %v2228_v50 }
0x1082   :  { %2230 = vmatprep.subr.bf16.mxu0 %v2395_v0 }
0x1085   :  { %2232 = vmatpush3.bf16.msra.mxu0 %v2231_v55 }
0x1086   :  { %2236 = vmatprep.subr.bf16.mxu0 %v2395_v0 }
0x1153   :  { %v840_v19 = vpop.f32.mrb[12].mxu0 }
0x1154   :  { %v844_v20 = vadd.f32 %v840_v19, %v162_v18  ;;  %v2096_v21 = vpop.f32.mrb[13].mxu0 }
0x1156   :  { %2315 = vtanh.f32 %v844_v20  ;;  %v1905_v23 = vmul.f32 -1.442695, %v844_v20 }
0x1158   :  { %2317 = vpow2.f32 %v1905_v23 }
0x1160   :  { %v2316_v22 = vpop.eup %2315 }
0x1161   :  { %854 = vrot.lane.b32.xlu0 %v2316_v22, %s2398_s30 }
0x1162   :  { %v2318_v24 = vpop.eup %2317 }
0x1163   :  { %v848_v25 = vadd.f32 1.0, %v2318_v24 }
0x1165   :  { %2319 = vrcp.f32 %v848_v25 }
0x116f   :  { %v2320_v26 = vpop.eup %2319 }
0x1170   :  { %v852_v29 = vmul.f32 %v2320_v26, %v762_v59 }
0x11d3   :  { %v855_v27 = vpop.permute.xlu0 %854 }
0x11d4   :  { %v857_v28 = vmul.f32 %v2320_v26, %v855_v27 }
0x11d6   :  { %859 = vrot.lane.b32.xlu1 %v857_v28, %s2399_s1 }
0x1248   :  { %v860_v30 = vpop.permute.xlu1 %859 }
0x1249   :  { %v862_v62 = vadd.f32 %v860_v30, %v852_v29 }
0x124b   :  { %2321 = vtanh.f32 %v862_v62 }
0x1255   :  { %v2322_v31 = vpop.eup %2321 }
0x1256   :  { %865 = vrot.lane.b32.xlu0 %v2322_v31, %s2398_s30 }
0x12c8   :  { %v866_v32 = vpop.permute.xlu0 %865 }
0x12c9   :  { %v868_v33 = vmul.f32 %v2320_v26, %v866_v32 }
0x12cb   :  { %870 = vrot.lane.b32.xlu1 %v868_v33, %s2399_s1 }
0x133d   :  { %v871_v34 = vpop.permute.xlu1 %870 }
0x133e   :  { %2106 = vmatmul.mubr.msk.f32.vlgmr.msra.gmra.mrb[8].mxu1 %vm170_vm2, %v871_v34 }
0x133f   :  { %2123 = vmatprep.mubr.msk.f32.mxu1 %vm2396_vm1, %v2397_v4  ;;  %2235 = vmatpush3.bf16.msra.mxu1 %v2614_v54 }
0x1340   :  { %2239 = vmatprep.subr.bf16.mxu1 %v2395_v0 }
0x1342   :  { %2124 = vmatmul.mubr.f32.vlgmr.msra.gmra.mrb[10].mxu1 %v2397_v4 }
0x1343   :  { %2241 = vmatpush3.bf16.msra.mxu1 %v2614_v54  ;;  %2137 = vmatprep.mubr.msk.f32.mxu1 %vm2396_vm1, %v2397_v4 }
0x1344   :  { %2245 = vmatprep.subr.bf16.mxu1 %v2395_v0 }
0x1411   :  { %v940_v36 = vpop.f32.mrb[8].mxu1 }
0x1412   :  { %v944_v37 = vadd.f32 %v940_v36, %v167_v35  ;;  %v2107_v38 = vpop.f32.mrb[9].mxu1 }
0x1414   :  { %2323 = vtanh.f32 %v944_v37  ;;  %v1907_v40 = vmul.f32 -1.442695, %v944_v37 }
0x1415   :  { %v1116_v63 = vpop.f32.mrb[10].mxu1 }
0x1416   :  { %2325 = vpow2.f32 %v1907_v40  ;;  %v2125_v1 = vpop.f32.mrb[11].mxu1 }
0x141e   :  { %v2324_v39 = vpop.eup %2323 }
0x141f   :  { %954 = vrot.lane.b32.xlu0 %v2324_v39, %s2398_s30 }
0x1420   :  { %v2326_v41 = vpop.eup %2325 }
0x1421   :  { %v948_v42 = vadd.f32 1.0, %v2326_v41 }
0x1423   :  { %2327 = vrcp.f32 %v948_v42 }
0x142d   :  { %v2328_v43 = vpop.eup %2327 }
0x142e   :  { %v952_v46 = vmul.f32 %v2328_v43, %v862_v62 }
0x1491   :  { %v955_v44 = vpop.permute.xlu0 %954 }
0x1492   :  { %v957_v45 = vmul.f32 %v2328_v43, %v955_v44 }
0x1494   :  { %959 = vrot.lane.b32.xlu1 %v957_v45, %s2399_s1 }
0x1506   :  { %v960_v47 = vpop.permute.xlu1 %959 }
0x1507   :  { %v962_v13 = vadd.f32 %v960_v47, %v952_v46 }
0x1509   :  { %2329 = vtanh.f32 %v962_v13 }
0x1513   :  { %v2330_v56 = vpop.eup %2329 }
0x1514   :  { %965 = vrot.lane.b32.xlu0 %v2330_v56, %s2398_s30 }
0x1586   :  { %v966_v57 = vpop.permute.xlu0 %965 }
0x1587   :  { %v968_v58 = vmul.f32 %v2328_v43, %v966_v57 }
0x1589   :  { %974 = vrot.lane.b32.xlu1 %v968_v58, %s2399_s1 }
0x15fb   :  { %v975_v60 = vpop.permute.xlu1 %974 }
0x15fc   :  { %2117 = vmatmul.mubr.msk.f32.vlgmr.msra.gmra.mrb[14].mxu0 %vm170_vm2, %v975_v60 }
0x15fd   :  { %2238 = vmatpush3.bf16.msra.mxu0 %v2614_v54  ;;  %2130 = vmatprep.mubr.msk.f32.mxu0 %vm2396_vm1, %v2397_v4 }
0x15fe   :  { %2242 = vmatprep.subr.bf16.mxu0 %v2395_v0 }
0x16cf   :  { %v1044_v3 = vpop.f32.mrb[14].mxu0 }
0x16d0   :  { %v2635_v9 = vadd.f32 %v1908_v2, %v1044_v3  ;;  %v2118_v5 = vpop.f32.mrb[15].mxu0 }
0x16d2   :  { %v1120_v6 = vadd.f32 %v1116_v63, %v2635_v9 }
0x16d4   :  { %2331 = vtanh.f32 %v1120_v6  ;;  %v1910_v8 = vmul.f32 -1.442695, %v1120_v6 }
0x16d6   :  { %2333 = vpow2.f32 %v1910_v8 }
0x16de   :  { %v2332_v7 = vpop.eup %2331 }
0x16df   :  { %1130 = vrot.lane.b32.xlu0 %v2332_v7, %s2400_s29 }
0x16e0   :  { %v2334_v11 = vpop.eup %2333 }
0x16e1   :  { %v1124_v10 = vadd.f32 1.0, %v2334_v11 }
0x16e3   :  { %2335 = vrcp.f32 %v1124_v10 }
0x16ed   :  { %v2336_v12 = vpop.eup %2335 }
0x16ee   :  { %v1128_v15 = vmul.f32 0.0, %v2336_v12 }
0x1751   :  { %v1131_v59 = vpop.permute.xlu0 %1130 }
0x1752   :  { %v1133_v14 = vmul.f32 %v2336_v12, %v1131_v59 }
0x1754   :  { %1135 = vrot.lane.b32.xlu1 %v1133_v14, %s2401_s2 }
0x17c6   :  { %v1136_v16 = vpop.permute.xlu1 %1135 }
0x17c7   :  { %v1138_v17 = vadd.f32 %v1136_v16, %v1128_v15 }
0x17c9   :  { %2337 = vtanh.f32 %v1138_v17 }
0x17d3   :  { %v2338_v18 = vpop.eup %2337 }
0x17d4   :  { %1141 = vrot.lane.b32.xlu0 %v2338_v18, %s2399_s1 }
0x1846   :  { %v1142_v19 = vpop.permute.xlu0 %1141 }
0x1847   :  { %v1144_v20 = vmul.f32 %v2336_v12, %v1142_v19 }
0x1849   :  { %1146 = vrot.lane.b32.xlu1 %v1144_v20, %s2402_s4 }
0x18bb   :  { %v1147_v21 = vpop.permute.xlu1 %1146 }
0x18bc   :  { %1149 = vst.msk [vmem:[%s2749_s3] sm:$0xff] %vm40_vm0, %v1147_v21  ;;  %2131 = vmatmul.mubr.msk.f32.vlgmr.msra.gmra.mrb[16].mxu0 %vm40_vm0, %v1147_v21 }
0x18bd   :  { %2244 = vmatpush3.bf16.msra.mxu0 %v2614_v54  ;;  %2144 = vmatprep.mubr.msk.f32.mxu0 %vm2396_vm1, %v2397_v4 }
0x18be   :  { %2248 = vmatprep.subr.bf16.mxu0 %v2395_v0 }
0x198f   :  { %v1218_v22 = vpop.f32.mrb[16].mxu0 }
0x1990   :  { %v1222_v23 = vadd.f32 %v1218_v22, %v2635_v9  ;;  %v2132_v24 = vpop.f32.mrb[17].mxu0 }
0x1992   :  { %2339 = vtanh.f32 %v1222_v23  ;;  %v1912_v26 = vmul.f32 -1.442695, %v1222_v23 }
0x1994   :  { %2341 = vpow2.f32 %v1912_v26 }
0x199c   :  { %v2340_v25 = vpop.eup %2339 }
0x199d   :  { %1232 = vrot.lane.b32.xlu0 %v2340_v25, %s2400_s29 }
0x199e   :  { %v2342_v27 = vpop.eup %2341 }
0x199f   :  { %v1226_v28 = vadd.f32 1.0, %v2342_v27 }
0x19a1   :  { %2343 = vrcp.f32 %v1226_v28 }
0x19ab   :  { %v2344_v29 = vpop.eup %2343 }
0x19ac   :  { %v1230_v31 = vmul.f32 %v2344_v29, %v1138_v17 }
0x1a0f   :  { %v1233_v30 = vpop.permute.xlu0 %1232 }
0x1a10   :  { %v1235_v62 = vmul.f32 %v2344_v29, %v1233_v30 }
0x1a12   :  { %1237 = vrot.lane.b32.xlu1 %v1235_v62, %s2401_s2 }
0x1a84   :  { %v1238_v32 = vpop.permute.xlu1 %1237 }
0x1a85   :  { %v1240_v33 = vadd.f32 %v1238_v32, %v1230_v31 }
0x1a87   :  { %2345 = vtanh.f32 %v1240_v33 }
0x1a91   :  { %v2346_v34 = vpop.eup %2345 }
0x1a92   :  { %1243 = vrot.lane.b32.xlu0 %v2346_v34, %s2399_s1 }
0x1b04   :  { %v1244_v35 = vpop.permute.xlu0 %1243 }
0x1b05   :  { %v2655_v36 = vmul.f32 %v2344_v29, %v1244_v35 }
0x1b07   :  { %1253 = vrot.lane.b32.xlu1 %v2655_v36, %s2402_s4 }
0x1b79   :  { %v1254_v37 = vpop.permute.xlu1 %1253 }
0x1b7a   :  { %2138 = vmatmul.mubr.msk.f32.vlgmr.msra.gmra.mrb[12].mxu1 %vm40_vm0, %v1254_v37 }
0x1b7b   :  { %2247 = vmatpush3.bf16.msra.mxu1 %v2614_v54  ;;  %2151 = vmatprep.mubr.msk.f32.mxu1 %vm2396_vm1, %v2397_v4 }
0x1b7c   :  { %2251 = vmatprep.subr.bf16.mxu1 %v2395_v0 }
0x1c4d   :  { %v1323_v38 = vpop.f32.mrb[12].mxu1 }
0x1c4e   :  { %v1327_v39 = vadd.f32 %v1323_v38, %v2635_v9  ;;  %v2139_v40 = vpop.f32.mrb[13].mxu1 }
0x1c50   :  { %2347 = vtanh.f32 %v1327_v39  ;;  %v1914_v42 = vmul.f32 -1.442695, %v1327_v39 }
0x1c52   :  { %2349 = vpow2.f32 %v1914_v42 }
0x1c5a   :  { %v2348_v41 = vpop.eup %2347 }
0x1c5b   :  { %1337 = vrot.lane.b32.xlu0 %v2348_v41, %s2400_s29 }
0x1c5c   :  { %v2350_v43 = vpop.eup %2349 }
0x1c5d   :  { %v1331_v44 = vadd.f32 1.0, %v2350_v43 }
0x1c5f   :  { %2351 = vrcp.f32 %v1331_v44 }
0x1c69   :  { %v2352_v45 = vpop.eup %2351 }
0x1c6a   :  { %v1335_v13 = vmul.f32 %v2352_v45, %v1240_v33 }
0x1ccd   :  { %v1338_v46 = vpop.permute.xlu0 %1337 }
0x1cce   :  { %v1340_v47 = vmul.f32 %v2352_v45, %v1338_v46 }
0x1cd0   :  { %1342 = vrot.lane.b32.xlu1 %v1340_v47, %s2401_s2 }
0x1d42   :  { %v1343_v61 = vpop.permute.xlu1 %1342 }
0x1d43   :  { %v1345_v48 = vadd.f32 %v1343_v61, %v1335_v13 }
0x1d45   :  { %2353 = vtanh.f32 %v1345_v48 }
0x1d4f   :  { %v2354_v49 = vpop.eup %2353 }
0x1d50   :  { %1348 = vrot.lane.b32.xlu0 %v2354_v49, %s2399_s1 }
0x1dc2   :  { %v1349_v50 = vpop.permute.xlu0 %1348 }
0x1dc3   :  { %v2668_v51 = vmul.f32 %v2352_v45, %v1349_v50 }
0x1dc5   :  { %1358 = vrot.lane.b32.xlu1 %v2668_v51, %s2402_s4 }
0x1e37   :  { %v1359_v52 = vpop.permute.xlu1 %1358 }
0x1e38   :  { %2145 = vmatmul.mubr.msk.f32.vlgmr.msra.gmra.mrb[18].mxu0 %vm40_vm0, %v1359_v52 }
0x1e39   :  { %2250 = vmatpush3.bf16.msra.mxu0 %v2614_v54  ;;  %2158 = vmatprep.mubr.msk.f32.mxu0 %vm2396_vm1, %v2397_v4 }
0x1e3a   :  { %2254 = vmatprep.subr.bf16.mxu0 %v2395_v0 }
0x1f0b   :  { %v1428_v53 = vpop.f32.mrb[18].mxu0 }
0x1f0c   :  { %v1432_v55 = vadd.f32 %v1428_v53, %v2635_v9  ;;  %v2146_v56 = vpop.f32.mrb[19].mxu0 }
0x1f0e   :  { %2355 = vtanh.f32 %v1432_v55  ;;  %v1916_v58 = vmul.f32 -1.442695, %v1432_v55 }
0x1f10   :  { %2357 = vpow2.f32 %v1916_v58 }
0x1f18   :  { %v2356_v57 = vpop.eup %2355 }
0x1f19   :  { %1442 = vrot.lane.b32.xlu0 %v2356_v57, %s2400_s29 }
0x1f1a   :  { %v2358_v60 = vpop.eup %2357 }
0x1f1b   :  { %v1436_v63 = vadd.f32 1.0, %v2358_v60 }
0x1f1d   :  { %2359 = vrcp.f32 %v1436_v63 }
0x1f27   :  { %v2360_v1 = vpop.eup %2359 }
0x1f28   :  { %v1440_v5 = vmul.f32 %v2360_v1, %v1345_v48 }
0x1f8b   :  { %v1443_v2 = vpop.permute.xlu0 %1442 }
0x1f8c   :  { %v1445_v3 = vmul.f32 %v2360_v1, %v1443_v2 }
0x1f8e   :  { %1447 = vrot.lane.b32.xlu1 %v1445_v3, %s2401_s2 }
0x2000   :  { %v1448_v0 = vpop.permute.xlu1 %1447 }
0x2001   :  { %v1450_v6 = vadd.f32 %v1448_v0, %v1440_v5 }
0x2003   :  { %2361 = vtanh.f32 %v1450_v6 }
0x200d   :  { %v2362_v7 = vpop.eup %2361 }
0x200e   :  { %1453 = vrot.lane.b32.xlu0 %v2362_v7, %s2399_s1 }
0x2080   :  { %v1454_v8 = vpop.permute.xlu0 %1453 }
0x2081   :  { %v2681_v11 = vmul.f32 %v2360_v1, %v1454_v8 }
0x2083   :  { %1460 = vrot.lane.b32.xlu1 %v2681_v11, %s2402_s4 }
0x20f5   :  { %v1461_v10 = vpop.permute.xlu1 %1460 }
0x20f6   :  { %2152 = vmatmul.mubr.msk.f32.vlgmr.msra.gmra.mrb[14].mxu1 %vm40_vm0, %v1461_v10 }
0x20f7   :  { %2253 = vmatpush3.bf16.msra.mxu1 %v2614_v54  ;;  %2165 = vmatprep.mubr.msk.f32.mxu1 %vm2396_vm1, %v2397_v4 }
0x21c9   :  { %v1530_v12 = vpop.f32.mrb[14].mxu1 }
0x21ca   :  { %v1534_v59 = vadd.f32 %v1530_v12, %v2635_v9  ;;  %v2153_v14 = vpop.f32.mrb[15].mxu1 }
0x21cc   :  { %2363 = vtanh.f32 %v1534_v59  ;;  %v1918_v16 = vmul.f32 -1.442695, %v1534_v59 }
0x21ce   :  { %2365 = vpow2.f32 %v1918_v16 }
0x21d6   :  { %v2364_v15 = vpop.eup %2363 }
0x21d7   :  { %1544 = vrot.lane.b32.xlu0 %v2364_v15, %s2400_s29 }
0x21d8   :  { %v2366_v17 = vpop.eup %2365 }
0x21d9   :  { %v1538_v18 = vadd.f32 1.0, %v2366_v17 }
0x21db   :  { %2367 = vrcp.f32 %v1538_v18 }
0x21e5   :  { %v2368_v19 = vpop.eup %2367 }
0x21e6   :  { %v1542_v22 = vmul.f32 %v2368_v19, %v1450_v6 }
0x2249   :  { %v1545_v20 = vpop.permute.xlu0 %1544 }
0x224a   :  { %v1547_v21 = vmul.f32 %v2368_v19, %v1545_v20 }
0x224c   :  { %1549 = vrot.lane.b32.xlu1 %v1547_v21, %s2401_s2 }
0x22be   :  { %v1550_v23 = vpop.permute.xlu1 %1549 }
0x22bf   :  { %v1552_v24 = vadd.f32 %v1550_v23, %v1542_v22 }
0x22c1   :  { %2369 = vtanh.f32 %v1552_v24 }
0x22cb   :  { %v2370_v25 = vpop.eup %2369 }
0x22cc   :  { %1555 = vrot.lane.b32.xlu0 %v2370_v25, %s2399_s1 }
0x233e   :  { %v1556_v26 = vpop.permute.xlu0 %1555 }
0x233f   :  { %v2693_v27 = vmul.f32 %v2368_v19, %v1556_v26 }
0x2341   :  { %1565 = vrot.lane.b32.xlu1 %v2693_v27, %s2402_s4 }
0x23b3   :  { %v1566_v28 = vpop.permute.xlu1 %1565 }
0x23b4   :  { %2159 = vmatmul.mubr.msk.f32.vlgmr.msra.gmra.mrb[20].mxu0 %vm40_vm0, %v1566_v28 }
0x23b5   :  { %2256 = vmatpush3.bf16.msra.mxu0 %v2614_v54  ;;  %2172 = vmatprep.mubr.msk.f32.mxu0 %vm2396_vm1, %v2397_v4 }
0x2487   :  { %v1635_v29 = vpop.f32.mrb[20].mxu0 }
0x2488   :  { %v1639_v30 = vadd.f32 %v1635_v29, %v2635_v9  ;;  %v2160_v62 = vpop.f32.mrb[21].mxu0 }
0x248a   :  { %2371 = vtanh.f32 %v1639_v30  ;;  %v1920_v32 = vmul.f32 -1.442695, %v1639_v30 }
0x248c   :  { %2373 = vpow2.f32 %v1920_v32 }
0x2494   :  { %v2372_v31 = vpop.eup %2371 }
0x2495   :  { %1649 = vrot.lane.b32.xlu0 %v2372_v31, %s2400_s29 }
0x2496   :  { %v2374_v33 = vpop.eup %2373 }
0x2497   :  { %v1643_v34 = vadd.f32 1.0, %v2374_v33 }
0x2499   :  { %2375 = vrcp.f32 %v1643_v34 }
0x24a3   :  { %v2376_v35 = vpop.eup %2375 }
0x24a4   :  { %v1647_v54 = vmul.f32 %v2376_v35, %v1552_v24 }
0x2507   :  { %v1650_v37 = vpop.permute.xlu0 %1649 }
0x2508   :  { %v1652_v38 = vmul.f32 %v2376_v35, %v1650_v37 }
0x250a   :  { %1654 = vrot.lane.b32.xlu1 %v1652_v38, %s2401_s2 }
0x257c   :  { %v1655_v4 = vpop.permute.xlu1 %1654 }
0x257d   :  { %v1657_v39 = vadd.f32 %v1655_v4, %v1647_v54 }
0x257f   :  { %2377 = vtanh.f32 %v1657_v39 }
0x2589   :  { %v2378_v40 = vpop.eup %2377 }
0x258a   :  { %1660 = vrot.lane.b32.xlu0 %v2378_v40, %s2399_s1 }
0x25fc   :  { %v1661_v41 = vpop.permute.xlu0 %1660 }
0x25fd   :  { %v1663_v42 = vmul.f32 %v2376_v35, %v1661_v41 }
0x25ff   :  { %1670 = vrot.lane.b32.xlu1 %v1663_v42, %s2402_s4 }
0x2671   :  { %v1671_v43 = vpop.permute.xlu1 %1670 }
0x2672   :  { %2166 = vmatmul.mubr.msk.f32.vlgmr.msra.gmra.mrb[16].mxu1 %vm40_vm0, %v1671_v43 }
0x2745   :  { %v1740_v44 = vpop.f32.mrb[16].mxu1 }
0x2746   :  { %v1744_v45 = vadd.f32 %v1740_v44, %v2635_v9  ;;  %v2167_v46 = vpop.f32.mrb[17].mxu1 }
0x2748   :  { %2379 = vtanh.f32 %v1744_v45  ;;  %v1922_v13 = vmul.f32 -1.442695, %v1744_v45 }
0x274a   :  { %2381 = vpow2.f32 %v1922_v13 }
0x2752   :  { %v2380_v47 = vpop.eup %2379 }
0x2753   :  { %1754 = vrot.lane.b32.xlu0 %v2380_v47, %s2400_s29 }
0x2754   :  { %v2382_v61 = vpop.eup %2381 }
0x2755   :  { %v1748_v48 = vadd.f32 1.0, %v2382_v61 }
0x2757   :  { %2383 = vrcp.f32 %v1748_v48 }
0x2761   :  { %v2384_v49 = vpop.eup %2383 }
0x2762   :  { %v1752_v53 = vmul.f32 %v2384_v49, %v1657_v39 }
0x27c5   :  { %v1755_v50 = vpop.permute.xlu0 %1754 }
0x27c6   :  { %v1757_v52 = vmul.f32 %v2384_v49, %v1755_v50 }
0x27c8   :  { %1759 = vrot.lane.b32.xlu1 %v1757_v52, %s2401_s2 }
0x283a   :  { %v1760_v55 = vpop.permute.xlu1 %1759 }
0x283b   :  { %v1762_v56 = vadd.f32 %v1760_v55, %v1752_v53 }
0x283d   :  { %2385 = vtanh.f32 %v1762_v56 }
0x2847   :  { %v2386_v57 = vpop.eup %2385 }
0x2848   :  { %1765 = vrot.lane.b32.xlu0 %v2386_v57, %s2399_s1 }
0x28ba   :  { %v1766_v58 = vpop.permute.xlu0 %1765 }
0x28bb   :  { %v1768_v60 = vmul.f32 %v2384_v49, %v1766_v58 }
0x28bd   :  { %1775 = vrot.lane.b32.xlu1 %v1768_v60, %s2402_s4 }
0x292f   :  { %v1776_v63 = vpop.permute.xlu1 %1775 }
0x2930   :  { %2173 = vmatmul.mubr.msk.f32.vlgmr.msra.gmra.mrb[22].mxu0 %vm40_vm0, %v1776_v63 }
0x2a03   :  { %v1845_v1 = vpop.f32.mrb[22].mxu0 }
0x2a04   :  { %v1849_v2 = vadd.f32 %v1845_v1, %v2635_v9  ;;  %v2174_v3 = vpop.f32.mrb[23].mxu0 }
0x2a06   :  { %2387 = vtanh.f32 %v1849_v2  ;;  %v1924_v0 = vmul.f32 -1.442695, %v1849_v2 }
0x2a08   :  { %2389 = vpow2.f32 %v1924_v0 }
0x2a10   :  { %v2388_v5 = vpop.eup %2387 }
0x2a11   :  { %1859 = vrot.lane.b32.xlu0 %v2388_v5, %s2400_s29 }
0x2a12   :  { %v2390_v6 = vpop.eup %2389 }
0x2a13   :  { %v1853_v7 = vadd.f32 1.0, %v2390_v6 }
0x2a15   :  { %2391 = vrcp.f32 %v1853_v7 }
0x2a1f   :  { %v2392_v8 = vpop.eup %2391 }
0x2a20   :  { %v1857_v9 = vmul.f32 %v2392_v8, %v1762_v56 }
0x2a83   :  { %v1860_v10 = vpop.permute.xlu0 %1859 }
0x2a84   :  { %v1862_v12 = vmul.f32 %v2392_v8, %v1860_v10 }
0x2a86   :  { %1864 = vrot.lane.b32.xlu1 %v1862_v12, %s2401_s2 }
0x2a8a   :  { %1248 = vrot.lane.b32.xlu1 %v2655_v36, %s2400_s29 }
0x2a8e   :  { %1560 = vrot.lane.b32.xlu1 %v2693_v27, %s2401_s2 }
0x2a92   :  { %1770 = vrot.lane.b32.xlu1 %v1768_v60, %s2403_s7 }
0x2af8   :  { %v1865_v59 = vpop.permute.xlu1 %1864 }
0x2af9   :  { %v1867_v14 = vadd.f32 %v1865_v59, %v1857_v9 }
0x2afb   :  { %2393 = vtanh.f32 %v1867_v14 }
0x2afc   :  { %v1249_v15 = vpop.permute.xlu1 %1248 }
0x2afd   :  { %1252 = vst.msk [vmem:[%s2749_s3] sm:$0xff] %vm1251_vm3, %v1249_v15 }
0x2b00   :  { %v1561_v18 = vpop.permute.xlu1 %1560 }
0x2b04   :  { %v1771_v20 = vpop.permute.xlu1 %1770 }
0x2b05   :  { %v2394_v16 = vpop.eup %2393 }
0x2b06   :  { %1870 = vrot.lane.b32.xlu0 %v2394_v16, %s2399_s1 }
0x2b0a   :  { %1353 = vrot.lane.b32.xlu0 %v2668_v51, %s2404_s10 }
0x2b0e   :  { %1665 = vrot.lane.b32.xlu0 %v1663_v42, %s2399_s1 }
0x2b78   :  { %v1871_v36 = vpop.permute.xlu0 %1870 }
0x2b79   :  { %v1873_v17 = vmul.f32 %v2392_v8, %v1871_v36 }
0x2b7b   :  { %1875 = vrot.lane.b32.xlu0 %v1873_v17, %s2398_s30 }
0x2b7c   :  { %v1354_v19 = vpop.permute.xlu0 %1353 }
0x2b7d   :  { %1357 = vst.msk [vmem:[%s2749_s3] sm:$0xff] %vm1356_vm4, %v1354_v19 }
0x2b7e   :  { %1458 = vst.msk [vmem:[%s2749_s3] sm:$0xff] %vm1457_vm5, %v2681_v11 }
0x2b7f   :  { %1564 = vst.msk [vmem:[%s2749_s3] sm:$0xff] %vm1563_vm6, %v1561_v18 }
0x2b80   :  { %v1666_v51 = vpop.permute.xlu0 %1665 }
0x2b81   :  { %1669 = vst.msk [vmem:[%s2749_s3] sm:$0xff] %vm1668_vm7, %v1666_v51 }
0x2b82   :  { %1774 = vst.msk [vmem:[%s2749_s3] sm:$0xff] %vm1773_vm8, %v1771_v20 }
0x2bed   :  { %v1876_v21 = vpop.permute.xlu0 %1875 }
0x2bee   :  { %1879 = vst.msk [vmem:[%s2749_s3] sm:$0xff] %vm1878_vm9, %v1876_v21 }

</bundles_post_ra>
